<compile_context>
chip_gen: v5e
topology: v5e:2x2
jax: 0.10.0
libtpu: 0.0.40
codegen_flags: <defaults>
</compile_context>

<pallas_src>
import functools

import jax
import jax.numpy as jnp
from jax.experimental import pallas as pl
from jax.experimental.pallas import tpu as pltpu


def _fused_gru_classifier_kernel(x_ref, *refs, num_layers, seq_len, batch):
    """refs: [wih_0, whh_0, bi_0, bhn_0, ..., wih_{L-1}, whh_{L-1}, bi_{L-1}, bhn_{L-1},
              w_head, b_head, o_ref, h_all_scratch]   (all VMEM-resident).

    x_ref   : (T*BP, I)  bf16, time-major rows (row = t*BP + b)
    wih_l   : (in, 3H)   bf16   gate order r|z|n along lanes
    whh_l   : (H, 3H)    bf16
    bi_l    : (1, 3H)    f32    [b_ir+b_hr | b_iz+b_hz | b_in]
    bhn_l   : (1, H)     f32    b_hn (stays inside the r-gated term, PyTorch semantics)
    """
    T, BP, L = seq_len, batch, num_layers
    f32, bf16 = jnp.float32, jnp.bfloat16

    w = refs[:4 * L]
    w_head_ref = refs[4 * L]
    b_head_ref = refs[4 * L + 1]
    o_ref = refs[4 * L + 2]
    h_all_ref = refs[4 * L + 3]          # (T*BP, H) f32 scratch

    H = w[1].shape[0]                    # whh_0 is (H, 3H)

    # ---- layer-0 input projection: one fused matmul over ALL time steps (off the
    #      recurrent critical path).
    gi = jnp.dot(x_ref[...], w[0][...], preferred_element_type=f32) + w[2][...]

    h = jnp.zeros((BP, H), f32)
    for l in range(L):
        whh = w[4 * l + 1][...]                                  # hoisted ref load
        b_hn = jnp.broadcast_to(w[4 * l + 3][...], (BP, H))      # hoisted broadcast

        h = jnp.zeros((BP, H), f32)
        for t in range(T):               # static unroll: T small, recurrence in vregs
            gi_t = gi[t * BP:(t + 1) * BP, :]                    # static sublane slice
            # single fused recurrent matmul on the serial critical path
            gh = jnp.dot(h.astype(bf16), whh, preferred_element_type=f32)  # (BP, 3H)
            rz = jax.nn.sigmoid(gi_t[:, :2 * H] + gh[:, :2 * H])
            r = rz[:, :H]
            z = rz[:, H:]
            n = jnp.tanh(gi_t[:, 2 * H:] + r * (gh[:, 2 * H:] + b_hn))
            h = (1.0 - z) * n + z * h
            h_all_ref[t * BP:(t + 1) * BP, :] = h                # bounds live range

        if l + 1 < L:
            # Next layer's input projection as ONE batched (T*BP, H) x (H, 3H) matmul,
            # off the next layer's recurrent critical path.
            gi = (jnp.dot(h_all_ref[...].astype(bf16), w[4 * (l + 1)][...],
                          preferred_element_type=f32)
                  + w[4 * (l + 1) + 2][...])

    # ---- classifier head on the last hidden state: Linear + log_softmax (fused)
    logits = (jnp.dot(h.astype(bf16), w_head_ref[...], preferred_element_type=f32)
              + b_head_ref[...])
    m = jnp.max(logits, axis=-1, keepdims=True)
    s = logits - m
    lse = jnp.log(jnp.sum(jnp.exp(s), axis=-1, keepdims=True))
    o_ref[...] = s - lse


def mnist_classifier_forward(inputs_bti, params):
    """inputs_bti: [B, T, input_size] -> log-probabilities [B, output_size]."""
    B, T, I = inputs_bti.shape
    layers = params["gru_layers"]
    L = len(layers)
    H = layers[0]["whh"].shape[0]
    O = params["w_head"].shape[1]
    BP = max(8, ((B + 7) // 8) * 8)      # pad batch to sublane width

    # time-major + batch pad: (B,T,I) -> (T,BP,I) -> (T*BP, I). Tiny one-off XLA ops.
    x_tbi = jnp.transpose(inputs_bti, (1, 0, 2))
    if BP != B:
        x_tbi = jnp.pad(x_tbi, ((0, 0), (0, BP - B), (0, 0)))
    x2d = x_tbi.reshape(T * BP, I).astype(jnp.bfloat16)

    flat = [x2d]
    for layer in layers:
        flat += [layer["wih"].astype(jnp.bfloat16),
                 layer["whh"].astype(jnp.bfloat16),
                 layer["bi"], layer["bhn"]]
    flat += [params["w_head"].astype(jnp.bfloat16), params["b_head"]]

    flops = (2 * T * BP * I * 3 * H                     # layer-0 input projection
             + L * 2 * T * BP * H * 3 * H               # recurrent matmuls
             + (L - 1) * 2 * T * BP * H * 3 * H         # inter-layer projections
             + 2 * BP * H * O)                          # head
    transcendentals = L * T * BP * 3 * H + BP * O
    bytes_accessed = sum(int(a.size) * a.dtype.itemsize for a in flat) + BP * O * 4

    kernel = functools.partial(_fused_gru_classifier_kernel,
                               num_layers=L, seq_len=T, batch=BP)
    vmem = pl.BlockSpec(memory_space=pltpu.MemorySpace.VMEM)
    out = pl.pallas_call(
        kernel,
        out_shape=jax.ShapeDtypeStruct((BP, O), jnp.float32),
        in_specs=[vmem] * len(flat),
        out_specs=vmem,
        scratch_shapes=[pltpu.VMEM((T * BP, H), jnp.float32)],
        cost_estimate=pl.CostEstimate(flops=flops,
                                      transcendentals=transcendentals,
                                      bytes_accessed=bytes_accessed),
    )(*flat)
    return out[:B]


def init_params(key, input_size, hidden_size, output_size, num_layers):
    H = hidden_size
    stdv = 1.0 / float(hidden_size) ** 0.5
    params = {"gru_layers": []}
    for l in range(num_layers):
        in_sz = input_size if l == 0 else hidden_size
        key, k1, k2, k3, k4 = jax.random.split(key, 5)
        wih = jax.random.uniform(k1, (in_sz, 3 * H), jnp.float32, -stdv, stdv)
        whh = jax.random.uniform(k2, (H, 3 * H), jnp.float32, -stdv, stdv)
        bih = jax.random.uniform(k3, (3 * H,), jnp.float32, -stdv, stdv)
        bhh = jax.random.uniform(k4, (3 * H,), jnp.float32, -stdv, stdv)
        # Packed gate order r|z|n. Combine r/z biases (b_i + b_h); keep b_hn separate
        # because PyTorch nn.GRU applies it inside the r-gated term.
        bi = jnp.concatenate([bih[:2 * H] + bhh[:2 * H], bih[2 * H:]])[None, :]
        bhn = bhh[2 * H:][None, :]
        params["gru_layers"].append({"wih": wih, "whh": whh, "bi": bi, "bhn": bhn})
    key, k5, k6 = jax.random.split(key, 3)
    params["w_head"] = jax.random.uniform(k5, (H, output_size),
                                          jnp.float32, -stdv, stdv)
    params["b_head"] = jax.random.uniform(k6, (1, output_size),
                                          jnp.float32, -stdv, stdv)
    return params


# ---------------------------------------------------------------------------
# Pure-JAX f32 reference (PyTorch nn.GRU semantics) for sanity checking.
# ---------------------------------------------------------------------------
def _reference_forward(inputs_bti, params):
    B, T, _ = inputs_bti.shape
    seq = inputs_bti
    h = None
    for layer in params["gru_layers"]:
        wih, whh, bi, bhn = layer["wih"], layer["whh"], layer["bi"], layer["bhn"]
        H = whh.shape[0]
        h = jnp.zeros((B, H), jnp.float32)
        outs = []
        for t in range(T):
            x_t = seq[:, t, :]
            gi = x_t @ wih + bi
            gh = h @ whh
            r = jax.nn.sigmoid(gi[:, :H] + gh[:, :H])
            z = jax.nn.sigmoid(gi[:, H:2 * H] + gh[:, H:2 * H])
            n = jnp.tanh(gi[:, 2 * H:] + r * (gh[:, 2 * H:] + bhn))
            h = (1.0 - z) * n + z * h
            outs.append(h)
        seq = jnp.stack(outs, axis=1)
    logits = h @ params["w_head"] + params["b_head"]
    return jax.nn.log_softmax(logits, axis=1)


if __name__ == "__main__":
    B, T, INPUT, HIDDEN, OUTPUT, NUM_LAYERS = 2, 8, 16, 32, 10, 2

    key = jax.random.PRNGKey(0)
    key, xk = jax.random.split(key)
    x = jax.random.normal(xk, (B, T, INPUT), jnp.float32)
    params = init_params(key, INPUT, HIDDEN, OUTPUT, NUM_LAYERS)

    fwd = jax.jit(mnist_classifier_forward)
    out = jax.block_until_ready(fwd(x, params))

    ref = _reference_forward(x, params)
    assert out.shape == (B, OUTPUT)
    # bf16 MXU operands (f32 accumulation/state) -> tolerance relaxed vs f32 reference.
    assert jnp.allclose(out, ref, atol=5e-2, rtol=5e-2), "mismatch vs reference"

    print("KERNEL_OK")
</pallas_src>

<mosaic_0001>
module attributes {stable_mosaic.version = 11 : i64} {
  func.func @_fused_gru_classifier_kernel(%arg0: memref<64x16xbf16, #tpu.memory_space<vmem>>, %arg1: memref<16x96xbf16, #tpu.memory_space<vmem>>, %arg2: memref<32x96xbf16, #tpu.memory_space<vmem>>, %arg3: memref<1x96xf32, #tpu.memory_space<vmem>>, %arg4: memref<1x32xf32, #tpu.memory_space<vmem>>, %arg5: memref<32x96xbf16, #tpu.memory_space<vmem>>, %arg6: memref<32x96xbf16, #tpu.memory_space<vmem>>, %arg7: memref<1x96xf32, #tpu.memory_space<vmem>>, %arg8: memref<1x32xf32, #tpu.memory_space<vmem>>, %arg9: memref<32x10xbf16, #tpu.memory_space<vmem>>, %arg10: memref<1x10xf32, #tpu.memory_space<vmem>>, %arg11: memref<8x10xf32, #tpu.memory_space<vmem>>, %arg12: memref<64x32xf32, #tpu.memory_space<vmem>>) attributes {dimension_semantics = [], scalar_prefetch = 0 : i64, scratch_operands = 1 : i64, tpu.core_type = #tpu.core_type<tc>} {
    %c0 = arith.constant 0 : index
    %c0_0 = arith.constant 0 : index
    %0 = vector.load %arg0[%c0, %c0_0] : memref<64x16xbf16, #tpu.memory_space<vmem>>, vector<64x16xbf16>
    %c0_1 = arith.constant 0 : index
    %c0_2 = arith.constant 0 : index
    %1 = vector.load %arg1[%c0_1, %c0_2] : memref<16x96xbf16, #tpu.memory_space<vmem>>, vector<16x96xbf16>
    %cst = arith.constant dense<0.000000e+00> : vector<64x96xf32>
    %2 = tpu.matmul %0, %1, %cst {dimension_numbers = #tpu.dot_dimension_numbers<[1], [0], [0], [1], [0, 0, 1, 1], [], []>} : vector<64x16xbf16>, vector<16x96xbf16>, vector<64x96xf32> -> vector<64x96xf32>
    %c0_3 = arith.constant 0 : index
    %c0_4 = arith.constant 0 : index
    %3 = vector.load %arg3[%c0_3, %c0_4] : memref<1x96xf32, #tpu.memory_space<vmem>>, vector<1x96xf32>
    %4 = vector.broadcast %3 : vector<1x96xf32> to vector<64x96xf32>
    %5 = arith.addf %2, %4 : vector<64x96xf32>
    %c0_5 = arith.constant 0 : index
    %c0_6 = arith.constant 0 : index
    %6 = vector.load %arg2[%c0_5, %c0_6] : memref<32x96xbf16, #tpu.memory_space<vmem>>, vector<32x96xbf16>
    %c0_7 = arith.constant 0 : index
    %c0_8 = arith.constant 0 : index
    %7 = vector.load %arg4[%c0_7, %c0_8] : memref<1x32xf32, #tpu.memory_space<vmem>>, vector<1x32xf32>
    %8 = vector.shape_cast %7 : vector<1x32xf32> to vector<1x32xf32>
    %9 = vector.broadcast %8 : vector<1x32xf32> to vector<8x32xf32>
    %cst_9 = arith.constant 0.000000e+00 : f32
    %10 = vector.broadcast %cst_9 : f32 to vector<8x32xf32>
    %11 = vector.extract_strided_slice %5 {offsets = [0, 0], sizes = [8, 96], strides = [1, 1]} : vector<64x96xf32> to vector<8x96xf32>
    %12 = arith.truncf %10 : vector<8x32xf32> to vector<8x32xbf16>
    %cst_10 = arith.constant dense<0.000000e+00> : vector<8x96xf32>
    %13 = tpu.matmul %12, %6, %cst_10 {dimension_numbers = #tpu.dot_dimension_numbers<[1], [0], [0], [1], [0, 0, 1, 1], [], []>} : vector<8x32xbf16>, vector<32x96xbf16>, vector<8x96xf32> -> vector<8x96xf32>
    %14 = vector.extract_strided_slice %11 {offsets = [0, 0], sizes = [8, 64], strides = [1, 1]} : vector<8x96xf32> to vector<8x64xf32>
    %15 = vector.extract_strided_slice %13 {offsets = [0, 0], sizes = [8, 64], strides = [1, 1]} : vector<8x96xf32> to vector<8x64xf32>
    %16 = arith.addf %14, %15 : vector<8x64xf32>
    %17 = arith.negf %16 : vector<8x64xf32>
    %18 = math.exp %17 : vector<8x64xf32>
    %cst_11 = arith.constant 1.000000e+00 : f32
    %19 = vector.broadcast %cst_11 : f32 to vector<8x64xf32>
    %20 = arith.addf %19, %18 : vector<8x64xf32>
    %21 = arith.divf %19, %20 : vector<8x64xf32>
    %22 = vector.extract_strided_slice %21 {offsets = [0, 0], sizes = [8, 32], strides = [1, 1]} : vector<8x64xf32> to vector<8x32xf32>
    %23 = vector.extract_strided_slice %21 {offsets = [0, 32], sizes = [8, 32], strides = [1, 1]} : vector<8x64xf32> to vector<8x32xf32>
    %24 = vector.extract_strided_slice %11 {offsets = [0, 64], sizes = [8, 32], strides = [1, 1]} : vector<8x96xf32> to vector<8x32xf32>
    %25 = vector.extract_strided_slice %13 {offsets = [0, 64], sizes = [8, 32], strides = [1, 1]} : vector<8x96xf32> to vector<8x32xf32>
    %26 = arith.addf %25, %9 : vector<8x32xf32>
    %27 = arith.mulf %22, %26 : vector<8x32xf32>
    %28 = arith.addf %24, %27 : vector<8x32xf32>
    %29 = math.tanh %28 : vector<8x32xf32>
    %cst_12 = arith.constant 1.000000e+00 : f32
    %30 = vector.broadcast %cst_12 : f32 to vector<8x32xf32>
    %31 = arith.subf %30, %23 : vector<8x32xf32>
    %32 = arith.mulf %31, %29 : vector<8x32xf32>
    %33 = arith.mulf %23, %10 : vector<8x32xf32>
    %34 = arith.addf %32, %33 : vector<8x32xf32>
    %c0_13 = arith.constant 0 : index
    %c0_14 = arith.constant 0 : index
    %35 = vector.load %arg12[%c0_13, %c0_14] : memref<64x32xf32, #tpu.memory_space<vmem>>, vector<8x32xf32>
    tpu.vector_store %arg12[%c0_13, %c0_14], %34 {strides = array<i32>} : memref<64x32xf32, #tpu.memory_space<vmem>>, vector<8x32xf32>,
    %36 = vector.extract_strided_slice %5 {offsets = [8, 0], sizes = [8, 96], strides = [1, 1]} : vector<64x96xf32> to vector<8x96xf32>
    %37 = arith.truncf %34 : vector<8x32xf32> to vector<8x32xbf16>
    %cst_15 = arith.constant dense<0.000000e+00> : vector<8x96xf32>
    %38 = tpu.matmul %37, %6, %cst_15 {dimension_numbers = #tpu.dot_dimension_numbers<[1], [0], [0], [1], [0, 0, 1, 1], [], []>} : vector<8x32xbf16>, vector<32x96xbf16>, vector<8x96xf32> -> vector<8x96xf32>
    %39 = vector.extract_strided_slice %36 {offsets = [0, 0], sizes = [8, 64], strides = [1, 1]} : vector<8x96xf32> to vector<8x64xf32>
    %40 = vector.extract_strided_slice %38 {offsets = [0, 0], sizes = [8, 64], strides = [1, 1]} : vector<8x96xf32> to vector<8x64xf32>
    %41 = arith.addf %39, %40 : vector<8x64xf32>
    %42 = arith.negf %41 : vector<8x64xf32>
    %43 = math.exp %42 : vector<8x64xf32>
    %cst_16 = arith.constant 1.000000e+00 : f32
    %44 = vector.broadcast %cst_16 : f32 to vector<8x64xf32>
    %45 = arith.addf %44, %43 : vector<8x64xf32>
    %46 = arith.divf %44, %45 : vector<8x64xf32>
    %47 = vector.extract_strided_slice %46 {offsets = [0, 0], sizes = [8, 32], strides = [1, 1]} : vector<8x64xf32> to vector<8x32xf32>
    %48 = vector.extract_strided_slice %46 {offsets = [0, 32], sizes = [8, 32], strides = [1, 1]} : vector<8x64xf32> to vector<8x32xf32>
    %49 = vector.extract_strided_slice %36 {offsets = [0, 64], sizes = [8, 32], strides = [1, 1]} : vector<8x96xf32> to vector<8x32xf32>
    %50 = vector.extract_strided_slice %38 {offsets = [0, 64], sizes = [8, 32], strides = [1, 1]} : vector<8x96xf32> to vector<8x32xf32>
    %51 = arith.addf %50, %9 : vector<8x32xf32>
    %52 = arith.mulf %47, %51 : vector<8x32xf32>
    %53 = arith.addf %49, %52 : vector<8x32xf32>
    %54 = math.tanh %53 : vector<8x32xf32>
    %cst_17 = arith.constant 1.000000e+00 : f32
    %55 = vector.broadcast %cst_17 : f32 to vector<8x32xf32>
    %56 = arith.subf %55, %48 : vector<8x32xf32>
    %57 = arith.mulf %56, %54 : vector<8x32xf32>
    %58 = arith.mulf %48, %34 : vector<8x32xf32>
    %59 = arith.addf %57, %58 : vector<8x32xf32>
    %c8 = arith.constant 8 : index
    %c0_18 = arith.constant 0 : index
    %60 = vector.load %arg12[%c8, %c0_18] : memref<64x32xf32, #tpu.memory_space<vmem>>, vector<8x32xf32>
    tpu.vector_store %arg12[%c8, %c0_18], %59 {strides = array<i32>} : memref<64x32xf32, #tpu.memory_space<vmem>>, vector<8x32xf32>,
    %61 = vector.extract_strided_slice %5 {offsets = [16, 0], sizes = [8, 96], strides = [1, 1]} : vector<64x96xf32> to vector<8x96xf32>
    %62 = arith.truncf %59 : vector<8x32xf32> to vector<8x32xbf16>
    %cst_19 = arith.constant dense<0.000000e+00> : vector<8x96xf32>
    %63 = tpu.matmul %62, %6, %cst_19 {dimension_numbers = #tpu.dot_dimension_numbers<[1], [0], [0], [1], [0, 0, 1, 1], [], []>} : vector<8x32xbf16>, vector<32x96xbf16>, vector<8x96xf32> -> vector<8x96xf32>
    %64 = vector.extract_strided_slice %61 {offsets = [0, 0], sizes = [8, 64], strides = [1, 1]} : vector<8x96xf32> to vector<8x64xf32>
    %65 = vector.extract_strided_slice %63 {offsets = [0, 0], sizes = [8, 64], strides = [1, 1]} : vector<8x96xf32> to vector<8x64xf32>
    %66 = arith.addf %64, %65 : vector<8x64xf32>
    %67 = arith.negf %66 : vector<8x64xf32>
    %68 = math.exp %67 : vector<8x64xf32>
    %cst_20 = arith.constant 1.000000e+00 : f32
    %69 = vector.broadcast %cst_20 : f32 to vector<8x64xf32>
    %70 = arith.addf %69, %68 : vector<8x64xf32>
    %71 = arith.divf %69, %70 : vector<8x64xf32>
    %72 = vector.extract_strided_slice %71 {offsets = [0, 0], sizes = [8, 32], strides = [1, 1]} : vector<8x64xf32> to vector<8x32xf32>
    %73 = vector.extract_strided_slice %71 {offsets = [0, 32], sizes = [8, 32], strides = [1, 1]} : vector<8x64xf32> to vector<8x32xf32>
    %74 = vector.extract_strided_slice %61 {offsets = [0, 64], sizes = [8, 32], strides = [1, 1]} : vector<8x96xf32> to vector<8x32xf32>
    %75 = vector.extract_strided_slice %63 {offsets = [0, 64], sizes = [8, 32], strides = [1, 1]} : vector<8x96xf32> to vector<8x32xf32>
    %76 = arith.addf %75, %9 : vector<8x32xf32>
    %77 = arith.mulf %72, %76 : vector<8x32xf32>
    %78 = arith.addf %74, %77 : vector<8x32xf32>
    %79 = math.tanh %78 : vector<8x32xf32>
    %cst_21 = arith.constant 1.000000e+00 : f32
    %80 = vector.broadcast %cst_21 : f32 to vector<8x32xf32>
    %81 = arith.subf %80, %73 : vector<8x32xf32>
    %82 = arith.mulf %81, %79 : vector<8x32xf32>
    %83 = arith.mulf %73, %59 : vector<8x32xf32>
    %84 = arith.addf %82, %83 : vector<8x32xf32>
    %c16 = arith.constant 16 : index
    %c0_22 = arith.constant 0 : index
    %85 = vector.load %arg12[%c16, %c0_22] : memref<64x32xf32, #tpu.memory_space<vmem>>, vector<8x32xf32>
    tpu.vector_store %arg12[%c16, %c0_22], %84 {strides = array<i32>} : memref<64x32xf32, #tpu.memory_space<vmem>>, vector<8x32xf32>,
    %86 = vector.extract_strided_slice %5 {offsets = [24, 0], sizes = [8, 96], strides = [1, 1]} : vector<64x96xf32> to vector<8x96xf32>
    %87 = arith.truncf %84 : vector<8x32xf32> to vector<8x32xbf16>
    %cst_23 = arith.constant dense<0.000000e+00> : vector<8x96xf32>
    %88 = tpu.matmul %87, %6, %cst_23 {dimension_numbers = #tpu.dot_dimension_numbers<[1], [0], [0], [1], [0, 0, 1, 1], [], []>} : vector<8x32xbf16>, vector<32x96xbf16>, vector<8x96xf32> -> vector<8x96xf32>
    %89 = vector.extract_strided_slice %86 {offsets = [0, 0], sizes = [8, 64], strides = [1, 1]} : vector<8x96xf32> to vector<8x64xf32>
    %90 = vector.extract_strided_slice %88 {offsets = [0, 0], sizes = [8, 64], strides = [1, 1]} : vector<8x96xf32> to vector<8x64xf32>
    %91 = arith.addf %89, %90 : vector<8x64xf32>
    %92 = arith.negf %91 : vector<8x64xf32>
    %93 = math.exp %92 : vector<8x64xf32>
    %cst_24 = arith.constant 1.000000e+00 : f32
    %94 = vector.broadcast %cst_24 : f32 to vector<8x64xf32>
    %95 = arith.addf %94, %93 : vector<8x64xf32>
    %96 = arith.divf %94, %95 : vector<8x64xf32>
    %97 = vector.extract_strided_slice %96 {offsets = [0, 0], sizes = [8, 32], strides = [1, 1]} : vector<8x64xf32> to vector<8x32xf32>
    %98 = vector.extract_strided_slice %96 {offsets = [0, 32], sizes = [8, 32], strides = [1, 1]} : vector<8x64xf32> to vector<8x32xf32>
    %99 = vector.extract_strided_slice %86 {offsets = [0, 64], sizes = [8, 32], strides = [1, 1]} : vector<8x96xf32> to vector<8x32xf32>
    %100 = vector.extract_strided_slice %88 {offsets = [0, 64], sizes = [8, 32], strides = [1, 1]} : vector<8x96xf32> to vector<8x32xf32>
    %101 = arith.addf %100, %9 : vector<8x32xf32>
    %102 = arith.mulf %97, %101 : vector<8x32xf32>
    %103 = arith.addf %99, %102 : vector<8x32xf32>
    %104 = math.tanh %103 : vector<8x32xf32>
    %cst_25 = arith.constant 1.000000e+00 : f32
    %105 = vector.broadcast %cst_25 : f32 to vector<8x32xf32>
    %106 = arith.subf %105, %98 : vector<8x32xf32>
    %107 = arith.mulf %106, %104 : vector<8x32xf32>
    %108 = arith.mulf %98, %84 : vector<8x32xf32>
    %109 = arith.addf %107, %108 : vector<8x32xf32>
    %c24 = arith.constant 24 : index
    %c0_26 = arith.constant 0 : index
    %110 = vector.load %arg12[%c24, %c0_26] : memref<64x32xf32, #tpu.memory_space<vmem>>, vector<8x32xf32>
    tpu.vector_store %arg12[%c24, %c0_26], %109 {strides = array<i32>} : memref<64x32xf32, #tpu.memory_space<vmem>>, vector<8x32xf32>,
    %111 = vector.extract_strided_slice %5 {offsets = [32, 0], sizes = [8, 96], strides = [1, 1]} : vector<64x96xf32> to vector<8x96xf32>
    %112 = arith.truncf %109 : vector<8x32xf32> to vector<8x32xbf16>
    %cst_27 = arith.constant dense<0.000000e+00> : vector<8x96xf32>
    %113 = tpu.matmul %112, %6, %cst_27 {dimension_numbers = #tpu.dot_dimension_numbers<[1], [0], [0], [1], [0, 0, 1, 1], [], []>} : vector<8x32xbf16>, vector<32x96xbf16>, vector<8x96xf32> -> vector<8x96xf32>
    %114 = vector.extract_strided_slice %111 {offsets = [0, 0], sizes = [8, 64], strides = [1, 1]} : vector<8x96xf32> to vector<8x64xf32>
    %115 = vector.extract_strided_slice %113 {offsets = [0, 0], sizes = [8, 64], strides = [1, 1]} : vector<8x96xf32> to vector<8x64xf32>
    %116 = arith.addf %114, %115 : vector<8x64xf32>
    %117 = arith.negf %116 : vector<8x64xf32>
    %118 = math.exp %117 : vector<8x64xf32>
    %cst_28 = arith.constant 1.000000e+00 : f32
    %119 = vector.broadcast %cst_28 : f32 to vector<8x64xf32>
    %120 = arith.addf %119, %118 : vector<8x64xf32>
    %121 = arith.divf %119, %120 : vector<8x64xf32>
    %122 = vector.extract_strided_slice %121 {offsets = [0, 0], sizes = [8, 32], strides = [1, 1]} : vector<8x64xf32> to vector<8x32xf32>
    %123 = vector.extract_strided_slice %121 {offsets = [0, 32], sizes = [8, 32], strides = [1, 1]} : vector<8x64xf32> to vector<8x32xf32>
    %124 = vector.extract_strided_slice %111 {offsets = [0, 64], sizes = [8, 32], strides = [1, 1]} : vector<8x96xf32> to vector<8x32xf32>
    %125 = vector.extract_strided_slice %113 {offsets = [0, 64], sizes = [8, 32], strides = [1, 1]} : vector<8x96xf32> to vector<8x32xf32>
    %126 = arith.addf %125, %9 : vector<8x32xf32>
    %127 = arith.mulf %122, %126 : vector<8x32xf32>
    %128 = arith.addf %124, %127 : vector<8x32xf32>
    %129 = math.tanh %128 : vector<8x32xf32>
    %cst_29 = arith.constant 1.000000e+00 : f32
    %130 = vector.broadcast %cst_29 : f32 to vector<8x32xf32>
    %131 = arith.subf %130, %123 : vector<8x32xf32>
    %132 = arith.mulf %131, %129 : vector<8x32xf32>
    %133 = arith.mulf %123, %109 : vector<8x32xf32>
    %134 = arith.addf %132, %133 : vector<8x32xf32>
    %c32 = arith.constant 32 : index
    %c0_30 = arith.constant 0 : index
    %135 = vector.load %arg12[%c32, %c0_30] : memref<64x32xf32, #tpu.memory_space<vmem>>, vector<8x32xf32>
    tpu.vector_store %arg12[%c32, %c0_30], %134 {strides = array<i32>} : memref<64x32xf32, #tpu.memory_space<vmem>>, vector<8x32xf32>,
    %136 = vector.extract_strided_slice %5 {offsets = [40, 0], sizes = [8, 96], strides = [1, 1]} : vector<64x96xf32> to vector<8x96xf32>
    %137 = arith.truncf %134 : vector<8x32xf32> to vector<8x32xbf16>
    %cst_31 = arith.constant dense<0.000000e+00> : vector<8x96xf32>
    %138 = tpu.matmul %137, %6, %cst_31 {dimension_numbers = #tpu.dot_dimension_numbers<[1], [0], [0], [1], [0, 0, 1, 1], [], []>} : vector<8x32xbf16>, vector<32x96xbf16>, vector<8x96xf32> -> vector<8x96xf32>
    %139 = vector.extract_strided_slice %136 {offsets = [0, 0], sizes = [8, 64], strides = [1, 1]} : vector<8x96xf32> to vector<8x64xf32>
    %140 = vector.extract_strided_slice %138 {offsets = [0, 0], sizes = [8, 64], strides = [1, 1]} : vector<8x96xf32> to vector<8x64xf32>
    %141 = arith.addf %139, %140 : vector<8x64xf32>
    %142 = arith.negf %141 : vector<8x64xf32>
    %143 = math.exp %142 : vector<8x64xf32>
    %cst_32 = arith.constant 1.000000e+00 : f32
    %144 = vector.broadcast %cst_32 : f32 to vector<8x64xf32>
    %145 = arith.addf %144, %143 : vector<8x64xf32>
    %146 = arith.divf %144, %145 : vector<8x64xf32>
    %147 = vector.extract_strided_slice %146 {offsets = [0, 0], sizes = [8, 32], strides = [1, 1]} : vector<8x64xf32> to vector<8x32xf32>
    %148 = vector.extract_strided_slice %146 {offsets = [0, 32], sizes = [8, 32], strides = [1, 1]} : vector<8x64xf32> to vector<8x32xf32>
    %149 = vector.extract_strided_slice %136 {offsets = [0, 64], sizes = [8, 32], strides = [1, 1]} : vector<8x96xf32> to vector<8x32xf32>
    %150 = vector.extract_strided_slice %138 {offsets = [0, 64], sizes = [8, 32], strides = [1, 1]} : vector<8x96xf32> to vector<8x32xf32>
    %151 = arith.addf %150, %9 : vector<8x32xf32>
    %152 = arith.mulf %147, %151 : vector<8x32xf32>
    %153 = arith.addf %149, %152 : vector<8x32xf32>
    %154 = math.tanh %153 : vector<8x32xf32>
    %cst_33 = arith.constant 1.000000e+00 : f32
    %155 = vector.broadcast %cst_33 : f32 to vector<8x32xf32>
    %156 = arith.subf %155, %148 : vector<8x32xf32>
    %157 = arith.mulf %156, %154 : vector<8x32xf32>
    %158 = arith.mulf %148, %134 : vector<8x32xf32>
    %159 = arith.addf %157, %158 : vector<8x32xf32>
    %c40 = arith.constant 40 : index
    %c0_34 = arith.constant 0 : index
    %160 = vector.load %arg12[%c40, %c0_34] : memref<64x32xf32, #tpu.memory_space<vmem>>, vector<8x32xf32>
    tpu.vector_store %arg12[%c40, %c0_34], %159 {strides = array<i32>} : memref<64x32xf32, #tpu.memory_space<vmem>>, vector<8x32xf32>,
    %161 = vector.extract_strided_slice %5 {offsets = [48, 0], sizes = [8, 96], strides = [1, 1]} : vector<64x96xf32> to vector<8x96xf32>
    %162 = arith.truncf %159 : vector<8x32xf32> to vector<8x32xbf16>
    %cst_35 = arith.constant dense<0.000000e+00> : vector<8x96xf32>
    %163 = tpu.matmul %162, %6, %cst_35 {dimension_numbers = #tpu.dot_dimension_numbers<[1], [0], [0], [1], [0, 0, 1, 1], [], []>} : vector<8x32xbf16>, vector<32x96xbf16>, vector<8x96xf32> -> vector<8x96xf32>
    %164 = vector.extract_strided_slice %161 {offsets = [0, 0], sizes = [8, 64], strides = [1, 1]} : vector<8x96xf32> to vector<8x64xf32>
    %165 = vector.extract_strided_slice %163 {offsets = [0, 0], sizes = [8, 64], strides = [1, 1]} : vector<8x96xf32> to vector<8x64xf32>
    %166 = arith.addf %164, %165 : vector<8x64xf32>
    %167 = arith.negf %166 : vector<8x64xf32>
    %168 = math.exp %167 : vector<8x64xf32>
    %cst_36 = arith.constant 1.000000e+00 : f32
    %169 = vector.broadcast %cst_36 : f32 to vector<8x64xf32>
    %170 = arith.addf %169, %168 : vector<8x64xf32>
    %171 = arith.divf %169, %170 : vector<8x64xf32>
    %172 = vector.extract_strided_slice %171 {offsets = [0, 0], sizes = [8, 32], strides = [1, 1]} : vector<8x64xf32> to vector<8x32xf32>
    %173 = vector.extract_strided_slice %171 {offsets = [0, 32], sizes = [8, 32], strides = [1, 1]} : vector<8x64xf32> to vector<8x32xf32>
    %174 = vector.extract_strided_slice %161 {offsets = [0, 64], sizes = [8, 32], strides = [1, 1]} : vector<8x96xf32> to vector<8x32xf32>
    %175 = vector.extract_strided_slice %163 {offsets = [0, 64], sizes = [8, 32], strides = [1, 1]} : vector<8x96xf32> to vector<8x32xf32>
    %176 = arith.addf %175, %9 : vector<8x32xf32>
    %177 = arith.mulf %172, %176 : vector<8x32xf32>
    %178 = arith.addf %174, %177 : vector<8x32xf32>
    %179 = math.tanh %178 : vector<8x32xf32>
    %cst_37 = arith.constant 1.000000e+00 : f32
    %180 = vector.broadcast %cst_37 : f32 to vector<8x32xf32>
    %181 = arith.subf %180, %173 : vector<8x32xf32>
    %182 = arith.mulf %181, %179 : vector<8x32xf32>
    %183 = arith.mulf %173, %159 : vector<8x32xf32>
    %184 = arith.addf %182, %183 : vector<8x32xf32>
    %c48 = arith.constant 48 : index
    %c0_38 = arith.constant 0 : index
    %185 = vector.load %arg12[%c48, %c0_38] : memref<64x32xf32, #tpu.memory_space<vmem>>, vector<8x32xf32>
    tpu.vector_store %arg12[%c48, %c0_38], %184 {strides = array<i32>} : memref<64x32xf32, #tpu.memory_space<vmem>>, vector<8x32xf32>,
    %186 = vector.extract_strided_slice %5 {offsets = [56, 0], sizes = [8, 96], strides = [1, 1]} : vector<64x96xf32> to vector<8x96xf32>
    %187 = arith.truncf %184 : vector<8x32xf32> to vector<8x32xbf16>
    %cst_39 = arith.constant dense<0.000000e+00> : vector<8x96xf32>
    %188 = tpu.matmul %187, %6, %cst_39 {dimension_numbers = #tpu.dot_dimension_numbers<[1], [0], [0], [1], [0, 0, 1, 1], [], []>} : vector<8x32xbf16>, vector<32x96xbf16>, vector<8x96xf32> -> vector<8x96xf32>
    %189 = vector.extract_strided_slice %186 {offsets = [0, 0], sizes = [8, 64], strides = [1, 1]} : vector<8x96xf32> to vector<8x64xf32>
    %190 = vector.extract_strided_slice %188 {offsets = [0, 0], sizes = [8, 64], strides = [1, 1]} : vector<8x96xf32> to vector<8x64xf32>
    %191 = arith.addf %189, %190 : vector<8x64xf32>
    %192 = arith.negf %191 : vector<8x64xf32>
    %193 = math.exp %192 : vector<8x64xf32>
    %cst_40 = arith.constant 1.000000e+00 : f32
    %194 = vector.broadcast %cst_40 : f32 to vector<8x64xf32>
    %195 = arith.addf %194, %193 : vector<8x64xf32>
    %196 = arith.divf %194, %195 : vector<8x64xf32>
    %197 = vector.extract_strided_slice %196 {offsets = [0, 0], sizes = [8, 32], strides = [1, 1]} : vector<8x64xf32> to vector<8x32xf32>
    %198 = vector.extract_strided_slice %196 {offsets = [0, 32], sizes = [8, 32], strides = [1, 1]} : vector<8x64xf32> to vector<8x32xf32>
    %199 = vector.extract_strided_slice %186 {offsets = [0, 64], sizes = [8, 32], strides = [1, 1]} : vector<8x96xf32> to vector<8x32xf32>
    %200 = vector.extract_strided_slice %188 {offsets = [0, 64], sizes = [8, 32], strides = [1, 1]} : vector<8x96xf32> to vector<8x32xf32>
    %201 = arith.addf %200, %9 : vector<8x32xf32>
    %202 = arith.mulf %197, %201 : vector<8x32xf32>
    %203 = arith.addf %199, %202 : vector<8x32xf32>
    %204 = math.tanh %203 : vector<8x32xf32>
    %cst_41 = arith.constant 1.000000e+00 : f32
    %205 = vector.broadcast %cst_41 : f32 to vector<8x32xf32>
    %206 = arith.subf %205, %198 : vector<8x32xf32>
    %207 = arith.mulf %206, %204 : vector<8x32xf32>
    %208 = arith.mulf %198, %184 : vector<8x32xf32>
    %209 = arith.addf %207, %208 : vector<8x32xf32>
    %c56 = arith.constant 56 : index
    %c0_42 = arith.constant 0 : index
    %210 = vector.load %arg12[%c56, %c0_42] : memref<64x32xf32, #tpu.memory_space<vmem>>, vector<8x32xf32>
    tpu.vector_store %arg12[%c56, %c0_42], %209 {strides = array<i32>} : memref<64x32xf32, #tpu.memory_space<vmem>>, vector<8x32xf32>,
    %c0_43 = arith.constant 0 : index
    %c0_44 = arith.constant 0 : index
    %211 = vector.load %arg12[%c0_43, %c0_44] : memref<64x32xf32, #tpu.memory_space<vmem>>, vector<64x32xf32>
    %212 = arith.truncf %211 : vector<64x32xf32> to vector<64x32xbf16>
    %c0_45 = arith.constant 0 : index
    %c0_46 = arith.constant 0 : index
    %213 = vector.load %arg5[%c0_45, %c0_46] : memref<32x96xbf16, #tpu.memory_space<vmem>>, vector<32x96xbf16>
    %cst_47 = arith.constant dense<0.000000e+00> : vector<64x96xf32>
    %214 = tpu.matmul %212, %213, %cst_47 {dimension_numbers = #tpu.dot_dimension_numbers<[1], [0], [0], [1], [0, 0, 1, 1], [], []>} : vector<64x32xbf16>, vector<32x96xbf16>, vector<64x96xf32> -> vector<64x96xf32>
    %c0_48 = arith.constant 0 : index
    %c0_49 = arith.constant 0 : index
    %215 = vector.load %arg7[%c0_48, %c0_49] : memref<1x96xf32, #tpu.memory_space<vmem>>, vector<1x96xf32>
    %216 = vector.broadcast %215 : vector<1x96xf32> to vector<64x96xf32>
    %217 = arith.addf %214, %216 : vector<64x96xf32>
    %c0_50 = arith.constant 0 : index
    %c0_51 = arith.constant 0 : index
    %218 = vector.load %arg6[%c0_50, %c0_51] : memref<32x96xbf16, #tpu.memory_space<vmem>>, vector<32x96xbf16>
    %c0_52 = arith.constant 0 : index
    %c0_53 = arith.constant 0 : index
    %219 = vector.load %arg8[%c0_52, %c0_53] : memref<1x32xf32, #tpu.memory_space<vmem>>, vector<1x32xf32>
    %220 = vector.shape_cast %219 : vector<1x32xf32> to vector<1x32xf32>
    %221 = vector.broadcast %220 : vector<1x32xf32> to vector<8x32xf32>
    %cst_54 = arith.constant 0.000000e+00 : f32
    %222 = vector.broadcast %cst_54 : f32 to vector<8x32xf32>
    %223 = vector.extract_strided_slice %217 {offsets = [0, 0], sizes = [8, 96], strides = [1, 1]} : vector<64x96xf32> to vector<8x96xf32>
    %224 = arith.truncf %222 : vector<8x32xf32> to vector<8x32xbf16>
    %cst_55 = arith.constant dense<0.000000e+00> : vector<8x96xf32>
    %225 = tpu.matmul %224, %218, %cst_55 {dimension_numbers = #tpu.dot_dimension_numbers<[1], [0], [0], [1], [0, 0, 1, 1], [], []>} : vector<8x32xbf16>, vector<32x96xbf16>, vector<8x96xf32> -> vector<8x96xf32>
    %226 = vector.extract_strided_slice %223 {offsets = [0, 0], sizes = [8, 64], strides = [1, 1]} : vector<8x96xf32> to vector<8x64xf32>
    %227 = vector.extract_strided_slice %225 {offsets = [0, 0], sizes = [8, 64], strides = [1, 1]} : vector<8x96xf32> to vector<8x64xf32>
    %228 = arith.addf %226, %227 : vector<8x64xf32>
    %229 = arith.negf %228 : vector<8x64xf32>
    %230 = math.exp %229 : vector<8x64xf32>
    %cst_56 = arith.constant 1.000000e+00 : f32
    %231 = vector.broadcast %cst_56 : f32 to vector<8x64xf32>
    %232 = arith.addf %231, %230 : vector<8x64xf32>
    %233 = arith.divf %231, %232 : vector<8x64xf32>
    %234 = vector.extract_strided_slice %233 {offsets = [0, 0], sizes = [8, 32], strides = [1, 1]} : vector<8x64xf32> to vector<8x32xf32>
    %235 = vector.extract_strided_slice %233 {offsets = [0, 32], sizes = [8, 32], strides = [1, 1]} : vector<8x64xf32> to vector<8x32xf32>
    %236 = vector.extract_strided_slice %223 {offsets = [0, 64], sizes = [8, 32], strides = [1, 1]} : vector<8x96xf32> to vector<8x32xf32>
    %237 = vector.extract_strided_slice %225 {offsets = [0, 64], sizes = [8, 32], strides = [1, 1]} : vector<8x96xf32> to vector<8x32xf32>
    %238 = arith.addf %237, %221 : vector<8x32xf32>
    %239 = arith.mulf %234, %238 : vector<8x32xf32>
    %240 = arith.addf %236, %239 : vector<8x32xf32>
    %241 = math.tanh %240 : vector<8x32xf32>
    %cst_57 = arith.constant 1.000000e+00 : f32
    %242 = vector.broadcast %cst_57 : f32 to vector<8x32xf32>
    %243 = arith.subf %242, %235 : vector<8x32xf32>
    %244 = arith.mulf %243, %241 : vector<8x32xf32>
    %245 = arith.mulf %235, %222 : vector<8x32xf32>
    %246 = arith.addf %244, %245 : vector<8x32xf32>
    %c0_58 = arith.constant 0 : index
    %c0_59 = arith.constant 0 : index
    %247 = vector.load %arg12[%c0_58, %c0_59] : memref<64x32xf32, #tpu.memory_space<vmem>>, vector<8x32xf32>
    tpu.vector_store %arg12[%c0_58, %c0_59], %246 {strides = array<i32>} : memref<64x32xf32, #tpu.memory_space<vmem>>, vector<8x32xf32>,
    %248 = vector.extract_strided_slice %217 {offsets = [8, 0], sizes = [8, 96], strides = [1, 1]} : vector<64x96xf32> to vector<8x96xf32>
    %249 = arith.truncf %246 : vector<8x32xf32> to vector<8x32xbf16>
    %cst_60 = arith.constant dense<0.000000e+00> : vector<8x96xf32>
    %250 = tpu.matmul %249, %218, %cst_60 {dimension_numbers = #tpu.dot_dimension_numbers<[1], [0], [0], [1], [0, 0, 1, 1], [], []>} : vector<8x32xbf16>, vector<32x96xbf16>, vector<8x96xf32> -> vector<8x96xf32>
    %251 = vector.extract_strided_slice %248 {offsets = [0, 0], sizes = [8, 64], strides = [1, 1]} : vector<8x96xf32> to vector<8x64xf32>
    %252 = vector.extract_strided_slice %250 {offsets = [0, 0], sizes = [8, 64], strides = [1, 1]} : vector<8x96xf32> to vector<8x64xf32>
    %253 = arith.addf %251, %252 : vector<8x64xf32>
    %254 = arith.negf %253 : vector<8x64xf32>
    %255 = math.exp %254 : vector<8x64xf32>
    %cst_61 = arith.constant 1.000000e+00 : f32
    %256 = vector.broadcast %cst_61 : f32 to vector<8x64xf32>
    %257 = arith.addf %256, %255 : vector<8x64xf32>
    %258 = arith.divf %256, %257 : vector<8x64xf32>
    %259 = vector.extract_strided_slice %258 {offsets = [0, 0], sizes = [8, 32], strides = [1, 1]} : vector<8x64xf32> to vector<8x32xf32>
    %260 = vector.extract_strided_slice %258 {offsets = [0, 32], sizes = [8, 32], strides = [1, 1]} : vector<8x64xf32> to vector<8x32xf32>
    %261 = vector.extract_strided_slice %248 {offsets = [0, 64], sizes = [8, 32], strides = [1, 1]} : vector<8x96xf32> to vector<8x32xf32>
    %262 = vector.extract_strided_slice %250 {offsets = [0, 64], sizes = [8, 32], strides = [1, 1]} : vector<8x96xf32> to vector<8x32xf32>
    %263 = arith.addf %262, %221 : vector<8x32xf32>
    %264 = arith.mulf %259, %263 : vector<8x32xf32>
    %265 = arith.addf %261, %264 : vector<8x32xf32>
    %266 = math.tanh %265 : vector<8x32xf32>
    %cst_62 = arith.constant 1.000000e+00 : f32
    %267 = vector.broadcast %cst_62 : f32 to vector<8x32xf32>
    %268 = arith.subf %267, %260 : vector<8x32xf32>
    %269 = arith.mulf %268, %266 : vector<8x32xf32>
    %270 = arith.mulf %260, %246 : vector<8x32xf32>
    %271 = arith.addf %269, %270 : vector<8x32xf32>
    %c8_63 = arith.constant 8 : index
    %c0_64 = arith.constant 0 : index
    %272 = vector.load %arg12[%c8_63, %c0_64] : memref<64x32xf32, #tpu.memory_space<vmem>>, vector<8x32xf32>
    tpu.vector_store %arg12[%c8_63, %c0_64], %271 {strides = array<i32>} : memref<64x32xf32, #tpu.memory_space<vmem>>, vector<8x32xf32>,
    %273 = vector.extract_strided_slice %217 {offsets = [16, 0], sizes = [8, 96], strides = [1, 1]} : vector<64x96xf32> to vector<8x96xf32>
    %274 = arith.truncf %271 : vector<8x32xf32> to vector<8x32xbf16>
    %cst_65 = arith.constant dense<0.000000e+00> : vector<8x96xf32>
    %275 = tpu.matmul %274, %218, %cst_65 {dimension_numbers = #tpu.dot_dimension_numbers<[1], [0], [0], [1], [0, 0, 1, 1], [], []>} : vector<8x32xbf16>, vector<32x96xbf16>, vector<8x96xf32> -> vector<8x96xf32>
    %276 = vector.extract_strided_slice %273 {offsets = [0, 0], sizes = [8, 64], strides = [1, 1]} : vector<8x96xf32> to vector<8x64xf32>
    %277 = vector.extract_strided_slice %275 {offsets = [0, 0], sizes = [8, 64], strides = [1, 1]} : vector<8x96xf32> to vector<8x64xf32>
    %278 = arith.addf %276, %277 : vector<8x64xf32>
    %279 = arith.negf %278 : vector<8x64xf32>
    %280 = math.exp %279 : vector<8x64xf32>
    %cst_66 = arith.constant 1.000000e+00 : f32
    %281 = vector.broadcast %cst_66 : f32 to vector<8x64xf32>
    %282 = arith.addf %281, %280 : vector<8x64xf32>
    %283 = arith.divf %281, %282 : vector<8x64xf32>
    %284 = vector.extract_strided_slice %283 {offsets = [0, 0], sizes = [8, 32], strides = [1, 1]} : vector<8x64xf32> to vector<8x32xf32>
    %285 = vector.extract_strided_slice %283 {offsets = [0, 32], sizes = [8, 32], strides = [1, 1]} : vector<8x64xf32> to vector<8x32xf32>
    %286 = vector.extract_strided_slice %273 {offsets = [0, 64], sizes = [8, 32], strides = [1, 1]} : vector<8x96xf32> to vector<8x32xf32>
    %287 = vector.extract_strided_slice %275 {offsets = [0, 64], sizes = [8, 32], strides = [1, 1]} : vector<8x96xf32> to vector<8x32xf32>
    %288 = arith.addf %287, %221 : vector<8x32xf32>
    %289 = arith.mulf %284, %288 : vector<8x32xf32>
    %290 = arith.addf %286, %289 : vector<8x32xf32>
    %291 = math.tanh %290 : vector<8x32xf32>
    %cst_67 = arith.constant 1.000000e+00 : f32
    %292 = vector.broadcast %cst_67 : f32 to vector<8x32xf32>
    %293 = arith.subf %292, %285 : vector<8x32xf32>
    %294 = arith.mulf %293, %291 : vector<8x32xf32>
    %295 = arith.mulf %285, %271 : vector<8x32xf32>
    %296 = arith.addf %294, %295 : vector<8x32xf32>
    %c16_68 = arith.constant 16 : index
    %c0_69 = arith.constant 0 : index
    %297 = vector.load %arg12[%c16_68, %c0_69] : memref<64x32xf32, #tpu.memory_space<vmem>>, vector<8x32xf32>
    tpu.vector_store %arg12[%c16_68, %c0_69], %296 {strides = array<i32>} : memref<64x32xf32, #tpu.memory_space<vmem>>, vector<8x32xf32>,
    %298 = vector.extract_strided_slice %217 {offsets = [24, 0], sizes = [8, 96], strides = [1, 1]} : vector<64x96xf32> to vector<8x96xf32>
    %299 = arith.truncf %296 : vector<8x32xf32> to vector<8x32xbf16>
    %cst_70 = arith.constant dense<0.000000e+00> : vector<8x96xf32>
    %300 = tpu.matmul %299, %218, %cst_70 {dimension_numbers = #tpu.dot_dimension_numbers<[1], [0], [0], [1], [0, 0, 1, 1], [], []>} : vector<8x32xbf16>, vector<32x96xbf16>, vector<8x96xf32> -> vector<8x96xf32>
    %301 = vector.extract_strided_slice %298 {offsets = [0, 0], sizes = [8, 64], strides = [1, 1]} : vector<8x96xf32> to vector<8x64xf32>
    %302 = vector.extract_strided_slice %300 {offsets = [0, 0], sizes = [8, 64], strides = [1, 1]} : vector<8x96xf32> to vector<8x64xf32>
    %303 = arith.addf %301, %302 : vector<8x64xf32>
    %304 = arith.negf %303 : vector<8x64xf32>
    %305 = math.exp %304 : vector<8x64xf32>
    %cst_71 = arith.constant 1.000000e+00 : f32
    %306 = vector.broadcast %cst_71 : f32 to vector<8x64xf32>
    %307 = arith.addf %306, %305 : vector<8x64xf32>
    %308 = arith.divf %306, %307 : vector<8x64xf32>
    %309 = vector.extract_strided_slice %308 {offsets = [0, 0], sizes = [8, 32], strides = [1, 1]} : vector<8x64xf32> to vector<8x32xf32>
    %310 = vector.extract_strided_slice %308 {offsets = [0, 32], sizes = [8, 32], strides = [1, 1]} : vector<8x64xf32> to vector<8x32xf32>
    %311 = vector.extract_strided_slice %298 {offsets = [0, 64], sizes = [8, 32], strides = [1, 1]} : vector<8x96xf32> to vector<8x32xf32>
    %312 = vector.extract_strided_slice %300 {offsets = [0, 64], sizes = [8, 32], strides = [1, 1]} : vector<8x96xf32> to vector<8x32xf32>
    %313 = arith.addf %312, %221 : vector<8x32xf32>
    %314 = arith.mulf %309, %313 : vector<8x32xf32>
    %315 = arith.addf %311, %314 : vector<8x32xf32>
    %316 = math.tanh %315 : vector<8x32xf32>
    %cst_72 = arith.constant 1.000000e+00 : f32
    %317 = vector.broadcast %cst_72 : f32 to vector<8x32xf32>
    %318 = arith.subf %317, %310 : vector<8x32xf32>
    %319 = arith.mulf %318, %316 : vector<8x32xf32>
    %320 = arith.mulf %310, %296 : vector<8x32xf32>
    %321 = arith.addf %319, %320 : vector<8x32xf32>
    %c24_73 = arith.constant 24 : index
    %c0_74 = arith.constant 0 : index
    %322 = vector.load %arg12[%c24_73, %c0_74] : memref<64x32xf32, #tpu.memory_space<vmem>>, vector<8x32xf32>
    tpu.vector_store %arg12[%c24_73, %c0_74], %321 {strides = array<i32>} : memref<64x32xf32, #tpu.memory_space<vmem>>, vector<8x32xf32>,
    %323 = vector.extract_strided_slice %217 {offsets = [32, 0], sizes = [8, 96], strides = [1, 1]} : vector<64x96xf32> to vector<8x96xf32>
    %324 = arith.truncf %321 : vector<8x32xf32> to vector<8x32xbf16>
    %cst_75 = arith.constant dense<0.000000e+00> : vector<8x96xf32>
    %325 = tpu.matmul %324, %218, %cst_75 {dimension_numbers = #tpu.dot_dimension_numbers<[1], [0], [0], [1], [0, 0, 1, 1], [], []>} : vector<8x32xbf16>, vector<32x96xbf16>, vector<8x96xf32> -> vector<8x96xf32>
    %326 = vector.extract_strided_slice %323 {offsets = [0, 0], sizes = [8, 64], strides = [1, 1]} : vector<8x96xf32> to vector<8x64xf32>
    %327 = vector.extract_strided_slice %325 {offsets = [0, 0], sizes = [8, 64], strides = [1, 1]} : vector<8x96xf32> to vector<8x64xf32>
    %328 = arith.addf %326, %327 : vector<8x64xf32>
    %329 = arith.negf %328 : vector<8x64xf32>
    %330 = math.exp %329 : vector<8x64xf32>
    %cst_76 = arith.constant 1.000000e+00 : f32
    %331 = vector.broadcast %cst_76 : f32 to vector<8x64xf32>
    %332 = arith.addf %331, %330 : vector<8x64xf32>
    %333 = arith.divf %331, %332 : vector<8x64xf32>
    %334 = vector.extract_strided_slice %333 {offsets = [0, 0], sizes = [8, 32], strides = [1, 1]} : vector<8x64xf32> to vector<8x32xf32>
    %335 = vector.extract_strided_slice %333 {offsets = [0, 32], sizes = [8, 32], strides = [1, 1]} : vector<8x64xf32> to vector<8x32xf32>
    %336 = vector.extract_strided_slice %323 {offsets = [0, 64], sizes = [8, 32], strides = [1, 1]} : vector<8x96xf32> to vector<8x32xf32>
    %337 = vector.extract_strided_slice %325 {offsets = [0, 64], sizes = [8, 32], strides = [1, 1]} : vector<8x96xf32> to vector<8x32xf32>
    %338 = arith.addf %337, %221 : vector<8x32xf32>
    %339 = arith.mulf %334, %338 : vector<8x32xf32>
    %340 = arith.addf %336, %339 : vector<8x32xf32>
    %341 = math.tanh %340 : vector<8x32xf32>
    %cst_77 = arith.constant 1.000000e+00 : f32
    %342 = vector.broadcast %cst_77 : f32 to vector<8x32xf32>
    %343 = arith.subf %342, %335 : vector<8x32xf32>
    %344 = arith.mulf %343, %341 : vector<8x32xf32>
    %345 = arith.mulf %335, %321 : vector<8x32xf32>
    %346 = arith.addf %344, %345 : vector<8x32xf32>
    %c32_78 = arith.constant 32 : index
    %c0_79 = arith.constant 0 : index
    %347 = vector.load %arg12[%c32_78, %c0_79] : memref<64x32xf32, #tpu.memory_space<vmem>>, vector<8x32xf32>
    tpu.vector_store %arg12[%c32_78, %c0_79], %346 {strides = array<i32>} : memref<64x32xf32, #tpu.memory_space<vmem>>, vector<8x32xf32>,
    %348 = vector.extract_strided_slice %217 {offsets = [40, 0], sizes = [8, 96], strides = [1, 1]} : vector<64x96xf32> to vector<8x96xf32>
    %349 = arith.truncf %346 : vector<8x32xf32> to vector<8x32xbf16>
    %cst_80 = arith.constant dense<0.000000e+00> : vector<8x96xf32>
    %350 = tpu.matmul %349, %218, %cst_80 {dimension_numbers = #tpu.dot_dimension_numbers<[1], [0], [0], [1], [0, 0, 1, 1], [], []>} : vector<8x32xbf16>, vector<32x96xbf16>, vector<8x96xf32> -> vector<8x96xf32>
    %351 = vector.extract_strided_slice %348 {offsets = [0, 0], sizes = [8, 64], strides = [1, 1]} : vector<8x96xf32> to vector<8x64xf32>
    %352 = vector.extract_strided_slice %350 {offsets = [0, 0], sizes = [8, 64], strides = [1, 1]} : vector<8x96xf32> to vector<8x64xf32>
    %353 = arith.addf %351, %352 : vector<8x64xf32>
    %354 = arith.negf %353 : vector<8x64xf32>
    %355 = math.exp %354 : vector<8x64xf32>
    %cst_81 = arith.constant 1.000000e+00 : f32
    %356 = vector.broadcast %cst_81 : f32 to vector<8x64xf32>
    %357 = arith.addf %356, %355 : vector<8x64xf32>
    %358 = arith.divf %356, %357 : vector<8x64xf32>
    %359 = vector.extract_strided_slice %358 {offsets = [0, 0], sizes = [8, 32], strides = [1, 1]} : vector<8x64xf32> to vector<8x32xf32>
    %360 = vector.extract_strided_slice %358 {offsets = [0, 32], sizes = [8, 32], strides = [1, 1]} : vector<8x64xf32> to vector<8x32xf32>
    %361 = vector.extract_strided_slice %348 {offsets = [0, 64], sizes = [8, 32], strides = [1, 1]} : vector<8x96xf32> to vector<8x32xf32>
    %362 = vector.extract_strided_slice %350 {offsets = [0, 64], sizes = [8, 32], strides = [1, 1]} : vector<8x96xf32> to vector<8x32xf32>
    %363 = arith.addf %362, %221 : vector<8x32xf32>
    %364 = arith.mulf %359, %363 : vector<8x32xf32>
    %365 = arith.addf %361, %364 : vector<8x32xf32>
    %366 = math.tanh %365 : vector<8x32xf32>
    %cst_82 = arith.constant 1.000000e+00 : f32
    %367 = vector.broadcast %cst_82 : f32 to vector<8x32xf32>
    %368 = arith.subf %367, %360 : vector<8x32xf32>
    %369 = arith.mulf %368, %366 : vector<8x32xf32>
    %370 = arith.mulf %360, %346 : vector<8x32xf32>
    %371 = arith.addf %369, %370 : vector<8x32xf32>
    %c40_83 = arith.constant 40 : index
    %c0_84 = arith.constant 0 : index
    %372 = vector.load %arg12[%c40_83, %c0_84] : memref<64x32xf32, #tpu.memory_space<vmem>>, vector<8x32xf32>
    tpu.vector_store %arg12[%c40_83, %c0_84], %371 {strides = array<i32>} : memref<64x32xf32, #tpu.memory_space<vmem>>, vector<8x32xf32>,
    %373 = vector.extract_strided_slice %217 {offsets = [48, 0], sizes = [8, 96], strides = [1, 1]} : vector<64x96xf32> to vector<8x96xf32>
    %374 = arith.truncf %371 : vector<8x32xf32> to vector<8x32xbf16>
    %cst_85 = arith.constant dense<0.000000e+00> : vector<8x96xf32>
    %375 = tpu.matmul %374, %218, %cst_85 {dimension_numbers = #tpu.dot_dimension_numbers<[1], [0], [0], [1], [0, 0, 1, 1], [], []>} : vector<8x32xbf16>, vector<32x96xbf16>, vector<8x96xf32> -> vector<8x96xf32>
    %376 = vector.extract_strided_slice %373 {offsets = [0, 0], sizes = [8, 64], strides = [1, 1]} : vector<8x96xf32> to vector<8x64xf32>
    %377 = vector.extract_strided_slice %375 {offsets = [0, 0], sizes = [8, 64], strides = [1, 1]} : vector<8x96xf32> to vector<8x64xf32>
    %378 = arith.addf %376, %377 : vector<8x64xf32>
    %379 = arith.negf %378 : vector<8x64xf32>
    %380 = math.exp %379 : vector<8x64xf32>
    %cst_86 = arith.constant 1.000000e+00 : f32
    %381 = vector.broadcast %cst_86 : f32 to vector<8x64xf32>
    %382 = arith.addf %381, %380 : vector<8x64xf32>
    %383 = arith.divf %381, %382 : vector<8x64xf32>
    %384 = vector.extract_strided_slice %383 {offsets = [0, 0], sizes = [8, 32], strides = [1, 1]} : vector<8x64xf32> to vector<8x32xf32>
    %385 = vector.extract_strided_slice %383 {offsets = [0, 32], sizes = [8, 32], strides = [1, 1]} : vector<8x64xf32> to vector<8x32xf32>
    %386 = vector.extract_strided_slice %373 {offsets = [0, 64], sizes = [8, 32], strides = [1, 1]} : vector<8x96xf32> to vector<8x32xf32>
    %387 = vector.extract_strided_slice %375 {offsets = [0, 64], sizes = [8, 32], strides = [1, 1]} : vector<8x96xf32> to vector<8x32xf32>
    %388 = arith.addf %387, %221 : vector<8x32xf32>
    %389 = arith.mulf %384, %388 : vector<8x32xf32>
    %390 = arith.addf %386, %389 : vector<8x32xf32>
    %391 = math.tanh %390 : vector<8x32xf32>
    %cst_87 = arith.constant 1.000000e+00 : f32
    %392 = vector.broadcast %cst_87 : f32 to vector<8x32xf32>
    %393 = arith.subf %392, %385 : vector<8x32xf32>
    %394 = arith.mulf %393, %391 : vector<8x32xf32>
    %395 = arith.mulf %385, %371 : vector<8x32xf32>
    %396 = arith.addf %394, %395 : vector<8x32xf32>
    %c48_88 = arith.constant 48 : index
    %c0_89 = arith.constant 0 : index
    %397 = vector.load %arg12[%c48_88, %c0_89] : memref<64x32xf32, #tpu.memory_space<vmem>>, vector<8x32xf32>
    tpu.vector_store %arg12[%c48_88, %c0_89], %396 {strides = array<i32>} : memref<64x32xf32, #tpu.memory_space<vmem>>, vector<8x32xf32>,
    %398 = vector.extract_strided_slice %217 {offsets = [56, 0], sizes = [8, 96], strides = [1, 1]} : vector<64x96xf32> to vector<8x96xf32>
    %399 = arith.truncf %396 : vector<8x32xf32> to vector<8x32xbf16>
    %cst_90 = arith.constant dense<0.000000e+00> : vector<8x96xf32>
    %400 = tpu.matmul %399, %218, %cst_90 {dimension_numbers = #tpu.dot_dimension_numbers<[1], [0], [0], [1], [0, 0, 1, 1], [], []>} : vector<8x32xbf16>, vector<32x96xbf16>, vector<8x96xf32> -> vector<8x96xf32>
    %401 = vector.extract_strided_slice %398 {offsets = [0, 0], sizes = [8, 64], strides = [1, 1]} : vector<8x96xf32> to vector<8x64xf32>
    %402 = vector.extract_strided_slice %400 {offsets = [0, 0], sizes = [8, 64], strides = [1, 1]} : vector<8x96xf32> to vector<8x64xf32>
    %403 = arith.addf %401, %402 : vector<8x64xf32>
    %404 = arith.negf %403 : vector<8x64xf32>
    %405 = math.exp %404 : vector<8x64xf32>
    %cst_91 = arith.constant 1.000000e+00 : f32
    %406 = vector.broadcast %cst_91 : f32 to vector<8x64xf32>
    %407 = arith.addf %406, %405 : vector<8x64xf32>
    %408 = arith.divf %406, %407 : vector<8x64xf32>
    %409 = vector.extract_strided_slice %408 {offsets = [0, 0], sizes = [8, 32], strides = [1, 1]} : vector<8x64xf32> to vector<8x32xf32>
    %410 = vector.extract_strided_slice %408 {offsets = [0, 32], sizes = [8, 32], strides = [1, 1]} : vector<8x64xf32> to vector<8x32xf32>
    %411 = vector.extract_strided_slice %398 {offsets = [0, 64], sizes = [8, 32], strides = [1, 1]} : vector<8x96xf32> to vector<8x32xf32>
    %412 = vector.extract_strided_slice %400 {offsets = [0, 64], sizes = [8, 32], strides = [1, 1]} : vector<8x96xf32> to vector<8x32xf32>
    %413 = arith.addf %412, %221 : vector<8x32xf32>
    %414 = arith.mulf %409, %413 : vector<8x32xf32>
    %415 = arith.addf %411, %414 : vector<8x32xf32>
    %416 = math.tanh %415 : vector<8x32xf32>
    %cst_92 = arith.constant 1.000000e+00 : f32
    %417 = vector.broadcast %cst_92 : f32 to vector<8x32xf32>
    %418 = arith.subf %417, %410 : vector<8x32xf32>
    %419 = arith.mulf %418, %416 : vector<8x32xf32>
    %420 = arith.mulf %410, %396 : vector<8x32xf32>
    %421 = arith.addf %419, %420 : vector<8x32xf32>
    %c56_93 = arith.constant 56 : index
    %c0_94 = arith.constant 0 : index
    %422 = vector.load %arg12[%c56_93, %c0_94] : memref<64x32xf32, #tpu.memory_space<vmem>>, vector<8x32xf32>
    tpu.vector_store %arg12[%c56_93, %c0_94], %421 {strides = array<i32>} : memref<64x32xf32, #tpu.memory_space<vmem>>, vector<8x32xf32>,
    %423 = arith.truncf %421 : vector<8x32xf32> to vector<8x32xbf16>
    %c0_95 = arith.constant 0 : index
    %c0_96 = arith.constant 0 : index
    %424 = vector.load %arg9[%c0_95, %c0_96] : memref<32x10xbf16, #tpu.memory_space<vmem>>, vector<32x10xbf16>
    %cst_97 = arith.constant dense<0.000000e+00> : vector<8x10xf32>
    %425 = tpu.matmul %423, %424, %cst_97 {dimension_numbers = #tpu.dot_dimension_numbers<[1], [0], [0], [1], [0, 0, 1, 1], [], []>} : vector<8x32xbf16>, vector<32x10xbf16>, vector<8x10xf32> -> vector<8x10xf32>
    %c0_98 = arith.constant 0 : index
    %c0_99 = arith.constant 0 : index
    %426 = vector.load %arg10[%c0_98, %c0_99] : memref<1x10xf32, #tpu.memory_space<vmem>>, vector<1x10xf32>
    %427 = vector.broadcast %426 : vector<1x10xf32> to vector<8x10xf32>
    %428 = arith.addf %425, %427 : vector<8x10xf32>
    %cst_100 = arith.constant dense<0xFF800000> : vector<8xf32>
    %429 = vector.multi_reduction <maximumf>, %428, %cst_100 [1] : vector<8x10xf32> to vector<8xf32>
    %430 = vector.shape_cast %429 : vector<8xf32> to vector<8x1xf32>
    %431 = vector.broadcast %430 : vector<8x1xf32> to vector<8x10xf32>
    %432 = arith.subf %428, %431 : vector<8x10xf32>
    %433 = math.exp %432 : vector<8x10xf32>
    %cst_101 = arith.constant dense<0.000000e+00> : vector<8xf32>
    %434 = vector.multi_reduction <add>, %433, %cst_101 [1] : vector<8x10xf32> to vector<8xf32>
    %435 = vector.shape_cast %434 : vector<8xf32> to vector<8x1xf32>
    %436 = math.log %435 : vector<8x1xf32>
    %437 = vector.broadcast %436 : vector<8x1xf32> to vector<8x10xf32>
    %438 = arith.subf %432, %437 : vector<8x10xf32>
    %c0_102 = arith.constant 0 : index
    %c0_103 = arith.constant 0 : index
    %439 = vector.load %arg11[%c0_102, %c0_103] : memref<8x10xf32, #tpu.memory_space<vmem>>, vector<8x10xf32>
    tpu.vector_store %arg11[%c0_102, %c0_103], %438 {strides = array<i32>} : memref<8x10xf32, #tpu.memory_space<vmem>>, vector<8x10xf32>,
    return
  }
}

</mosaic_0001>

<bundles_post_ra>
// kernel: mnist_classifier_forward.1
= control target key start
LH: loop header
LB: loop body
LE: loop exit
PB: predicated region body
PF: predicated region fallthrough
CT: control target
= control target key end

     0   :  { %vm79_vm0 = vcmask 130048   ;;  %s1539_s27 = smov 64   ;;  %v1540_v5 = vmov 0   ;;  %vm140_vm5 = vcmask 261120   ;;  %s1957_s2 = inlined_call_operand.vmem [shape: bf16[32,96], index: 2, kind: input, shape index: {}]   ;;  %s1958_s1 = inlined_call_operand.vmem [shape: bf16[16,96], index: 1, kind: input, shape index: {}]   ;;  %s1959_s0 = inlined_call_operand.vmem [shape: bf16[64,16], index: 0, kind: input, shape index: {}]   ;;  %s1960_s4 = inlined_call_operand.vmem [shape: f32[1,32], index: 4, kind: input, shape index: {}]   ;;  %s1961_s3 = inlined_call_operand.vmem [shape: f32[1,96], index: 3, kind: input, shape index: {}]   ;;  %s1962_s5 = inlined_call_operand.vmem [shape: bf16[32,96], index: 5, kind: input, shape index: {}]   ;;  %s1963_s8 = inlined_call_operand.vmem [shape: f32[1,32], index: 8, kind: input, shape index: {}]   ;;  %s1964_s7 = inlined_call_operand.vmem [shape: f32[1,96], index: 7, kind: input, shape index: {}]   ;;  %s1965_s6 = inlined_call_operand.vmem [shape: bf16[32,96], index: 6, kind: input, shape index: {}]   ;;  %s1966_s9 = inlined_call_operand.vmem [shape: bf16[32,10], index: 9, kind: input, shape index: {}]   ;;  %s1967_s10 = inlined_call_operand.vmem [shape: f32[1,10], index: 10, kind: input, shape index: {}]   ;;  %s1968_s11 = inlined_call_operand.vmem [shape: f32[8,10], index: 11, kind: output, shape index: {}]  }
   0x1   :  { %v1605_v0 = vld [vmem:[%s1957_s2 + $0x8] sm:$0xff]  ;;  %v1421_v1 = vld [vmem:[%s1958_s1] sm:$0xff] }
   0x2   :  { %v1417_v2 = vld [vmem:[%s1959_s0] sm:$0xff]  ;;  %150 = vmatpush.bf16.msra.mxu1 %v1605_v0  ;;  %99 = vmatpush.bf16.msra.mxu0 %v1421_v1 }
   0x3   :  { %v1433_v3 = vld [vmem:[%s1960_s4] ss:$0 sm:$0xff]  ;;  %218 = vmatpush.bf16.msra.mxu2 %v1605_v0  ;;  %283 = vmatpush.bf16.msra.mxu3 %v1605_v0  ;;  %s1541_s4 = smov 96  }
   0x4   :  { %v1620_v4 = vld [vmem:[%s1957_s2] sm:$0xff]  ;;  %177 = vrot.lane.b32.xlu0 %v1433_v3, %s1539_s27 }
   0x5   :  { %1346 = vmatmul.msk.bf16.vlgmr.msra.gmra.mxu0 %vm79_vm0, %v1417_v2  ;;  %v1645_v10 = vld [vmem:[%s1961_s3] ss:$0 sm:$0xff] }
   0x6   :  { %151 = vmatpush.bf16.msra.mxu1 %v1620_v4 }
   0x7   :  { %219 = vmatpush.bf16.msra.mxu2 %v1620_v4  ;;  %284 = vmatpush.bf16.msra.mxu3 %v1620_v4 }
   0x9   :  { %152 = vmatmul.bf16.vlgmr.msra.gmra.mxu1 %v1540_v5 }
   0xa   :  { %348 = vmatpush.bf16.msrb.mxu1 %v1605_v0 }
   0xb   :  { %413 = vmatpush.bf16.msrb.mxu2 %v1605_v0  ;;  %478 = vmatpush.bf16.msrb.mxu3 %v1605_v0 }
   0xe   :  { %349 = vmatpush.bf16.msrb.mxu1 %v1620_v4 }
   0xf   :  { %414 = vmatpush.bf16.msrb.mxu2 %v1620_v4  ;;  %479 = vmatpush.bf16.msrb.mxu3 %v1620_v4 }
  0x12   :  { %543 = vmatpush.bf16.msra.mxu1 %v1605_v0 }
  0x16   :  { %544 = vmatpush.bf16.msra.mxu1 %v1620_v4 }
  0x76   :  { %v1638_v6 = vpop.permute.xlu0 %177 }
  0x82   :  { %v101_v11 = vpop.f32.mrf.mxu0 }
  0x83   :  { %v102_v12 = vadd.f32 %v1645_v10, %v101_v11 }
  0x86   :  { %v153_v7 = vpop.f32.mrf.mxu1 }
  0x87   :  { %v180_v8 = vadd.f32 %v1638_v6, %v153_v7  ;;  %v157_v13 = vadd.f32 %v153_v7, %v102_v12  ;;  %v1418_v7 = vld [vmem:[%s1959_s0 + $0x8] sm:$0xff] }
  0x88   :  { %1347 = vmatmul.msk.bf16.gmra.mxu0 %vm79_vm0, %v1418_v7 }
  0x89   :  { %182 = vrot.lane.b32.xlu0 %v180_v8, %s1539_s27  ;;  %v1358_v14 = vmul.f32 -1.442695, %v157_v13 }
  0x8a   :  { %v103_v42 = vpop.f32.mrf.mxu0 }
  0x8b   :  { %1438 = vpow2.f32 %v1358_v14  ;;  %v104_v43 = vadd.f32 %v1645_v10, %v103_v42 }
  0x8e   :  { %v155_v9 = vpop.f32.mrf.mxu1 }
  0x91   :  { %v1439_v15 = vpop.eup %1438 }
  0x92   :  { %v161_v16 = vadd.f32 1.0, %v1439_v15 }
  0x94   :  { %1440 = vrcp.f32 %v161_v16  ;;  %v173_v22 = vand.u32 2147483648, %v161_v16  ;;  %vm167_vm2 = vweird.f32 %v161_v16  ;;  %v171_v23 = vand.u32 2147483647, %v161_v16 }
  0x96   :  { %v174_v25 = vor.u32 1.1754944e-38, %v173_v22  ;;  %vm172_vm4 = vcmp.eq.f32.partialorder %v171_v23, 8.507059e+37 }
  0x9a   :  { %v1441_v17 = vpop.eup %1440 }
  0x9b   :  { %v163_v18 = vmul.f32 %v1441_v17, %v161_v16  ;;  %vm168_vm1 = vweird.f32 %v1441_v17 }
  0x9c   :  { %vm169_vm3 = vmor %vm167_vm2, %vm168_vm1 }
  0x9d   :  { %v164_v19 = vsub.f32 1.0, %v163_v18 }
  0x9f   :  { %v165_v20 = vmul.f32 %v1441_v17, %v164_v19 }
  0xa1   :  { %v166_v21 = vadd.f32 %v1441_v17, %v165_v20 }
  0xa3   :  { %v170_v24 = vsel %vm169_vm3, %v1441_v17, %v166_v21 }
  0xa4   :  { %v175_v27 = vsel %vm172_vm4, %v174_v25, %v170_v24 }
  0xa5   :  { %v192_v32 = vsub.f32 1.0, %v175_v27  ;;  %v198_v34 = vmul.f32 0.0, %v175_v27 }
  0xfb   :  { %v183_v26 = vpop.permute.xlu0 %182 }
  0xfc   :  { %v185_v28 = vmul.f32 %v183_v26, %v175_v27 }
  0xfe   :  { %187 = vrot.lane.b32.xlu1 %v185_v28, %s1539_s27 }
 0x105   :  { %v106_v13 = vpop.f32.mrf.mxu0 }
 0x106   :  { %v107_v14 = vadd.f32 %v1645_v10, %v106_v13 }
 0x170   :  { %v188_v29 = vpop.permute.xlu1 %187 }
 0x171   :  { %v190_v30 = vadd.f32 %v188_v29, %v102_v12 }
 0x173   :  { %1442 = vtanh.f32 %v190_v30 }
 0x179   :  { %v1443_v31 = vpop.eup %1442 }
 0x17a   :  { %194 = vrot.lane.b32.xlu1 %v1443_v31, %s1541_s4 }
 0x1ec   :  { %v195_v33 = vpop.permute.xlu1 %194 }
 0x1ed   :  { %v197_v35 = vmul.f32 %v195_v33, %v192_v32 }
 0x1ef   :  { %v1650_v36 = vadd.f32 %v198_v34, %v197_v35 }
 0x1f1   :  { %v205_v37 = vpack.c.bf16 %v1650_v36, %v1650_v36 }
 0x1f3   :  { %207 = vrot.lane.b32.xlu2 %v205_v37, %s1541_s4 }
 0x24d   :  { %v208_v38 = vpop.permute.xlu2 %207 }
 0x24e   :  { %1359 = vmatmul.msk.bf16.vlgmr.msra.gmra.mxu2 %vm140_vm5, %v208_v38 }
 0x24f   :  { %608 = vmatpush.bf16.msra.mxu2 %v1605_v0 }
 0x253   :  { %609 = vmatpush.bf16.msra.mxu2 %v1620_v4 }
 0x2d1   :  { %v221_v39 = vpop.f32.mrf.mxu2 }
 0x2d2   :  { %v245_v40 = vadd.f32 %v221_v39, %v1638_v6  ;;  %v225_v44 = vadd.f32 %v221_v39, %v104_v43 }
 0x2d4   :  { %247 = vrot.lane.b32.xlu2 %v245_v40, %s1539_s27  ;;  %v1360_v45 = vmul.f32 -1.442695, %v225_v44 }
 0x2d6   :  { %1444 = vpow2.f32 %v1360_v45  ;;  %v108_v45 = vpop.f32.mrf.mxu0 }
 0x2d9   :  { %v223_v41 = vpop.f32.mrf.mxu2 }
 0x2dc   :  { %v1445_v46 = vpop.eup %1444 }
 0x2dd   :  { %v229_v47 = vadd.f32 1.0, %v1445_v46  ;;  %v109_v46 = vadd.f32 %v1645_v10, %v108_v45 }
 0x2df   :  { %1446 = vrcp.f32 %v229_v47  ;;  %v241_v53 = vand.u32 2147483648, %v229_v47  ;;  %vm235_vm7 = vweird.f32 %v229_v47  ;;  %v239_v54 = vand.u32 2147483647, %v229_v47 }
 0x2e1   :  { %v242_v56 = vor.u32 1.1754944e-38, %v241_v53  ;;  %vm240_vm9 = vcmp.eq.f32.partialorder %v239_v54, 8.507059e+37 }
 0x2e5   :  { %v1447_v48 = vpop.eup %1446 }
 0x2e6   :  { %v231_v49 = vmul.f32 %v1447_v48, %v229_v47  ;;  %vm236_vm6 = vweird.f32 %v1447_v48 }
 0x2e7   :  { %vm237_vm8 = vmor %vm235_vm7, %vm236_vm6 }
 0x2e8   :  { %v232_v50 = vsub.f32 1.0, %v231_v49 }
 0x2ea   :  { %v233_v51 = vmul.f32 %v1447_v48, %v232_v50 }
 0x2ec   :  { %v234_v52 = vadd.f32 %v1447_v48, %v233_v51 }
 0x2ee   :  { %v238_v55 = vsel %vm237_vm8, %v1447_v48, %v234_v52 }
 0x2ef   :  { %v243_v58 = vsel %vm240_vm9, %v242_v56, %v238_v55 }
 0x2f0   :  { %v257_v63 = vsub.f32 1.0, %v243_v58  ;;  %v263_v1 = vmul.f32 %v243_v58, %v1650_v36 }
 0x32e   :  { %v248_v57 = vpop.permute.xlu2 %247 }
 0x32f   :  { %v250_v59 = vmul.f32 %v248_v57, %v243_v58 }
 0x331   :  { %252 = vrot.lane.b32.xlu0 %v250_v59, %s1539_s27 }
 0x3a3   :  { %v253_v60 = vpop.permute.xlu0 %252 }
 0x3a4   :  { %v255_v61 = vadd.f32 %v253_v60, %v104_v43 }
 0x3a6   :  { %1448 = vtanh.f32 %v255_v61 }
 0x3ac   :  { %v1449_v62 = vpop.eup %1448 }
 0x3ad   :  { %259 = vrot.lane.b32.xlu1 %v1449_v62, %s1541_s4 }
 0x41f   :  { %v260_v0 = vpop.permute.xlu1 %259 }
 0x420   :  { %v262_v2 = vmul.f32 %v260_v0, %v257_v63 }
 0x422   :  { %v1664_v3 = vadd.f32 %v263_v1, %v262_v2 }
 0x424   :  { %v270_v4 = vpack.c.bf16 %v1664_v3, %v1664_v3 }
 0x426   :  { %272 = vrot.lane.b32.xlu2 %v270_v4, %s1541_s4 }
 0x480   :  { %v273_v8 = vpop.permute.xlu2 %272 }
 0x481   :  { %1361 = vmatmul.msk.bf16.vlgmr.msra.gmra.mxu3 %vm140_vm5, %v273_v8 }
 0x504   :  { %v286_v9 = vpop.f32.mrf.mxu3 }
 0x505   :  { %v310_v11 = vadd.f32 %v286_v9, %v1638_v6  ;;  %v290_v15 = vadd.f32 %v286_v9, %v107_v14 }
 0x507   :  { %312 = vrot.lane.b32.xlu0 %v310_v11, %s1539_s27  ;;  %v1362_v16 = vmul.f32 -1.442695, %v290_v15 }
 0x509   :  { %1450 = vpow2.f32 %v1362_v16 }
 0x50c   :  { %v288_v12 = vpop.f32.mrf.mxu3 }
 0x50d   :  { %v1419_v12 = vld [vmem:[%s1959_s0 + $0x10] sm:$0xff] }
 0x50e   :  { %1348 = vmatmul.msk.bf16.gmra.mxu0 %vm79_vm0, %v1419_v12 }
 0x50f   :  { %v1451_v17 = vpop.eup %1450 }
 0x510   :  { %v294_v18 = vadd.f32 1.0, %v1451_v17 }
 0x512   :  { %1452 = vrcp.f32 %v294_v18  ;;  %v306_v24 = vand.u32 2147483648, %v294_v18  ;;  %vm300_vm11 = vweird.f32 %v294_v18  ;;  %v304_v25 = vand.u32 2147483647, %v294_v18 }
 0x514   :  { %v307_v27 = vor.u32 1.1754944e-38, %v306_v24  ;;  %vm305_vm13 = vcmp.eq.f32.partialorder %v304_v25, 8.507059e+37 }
 0x518   :  { %v1453_v19 = vpop.eup %1452 }
 0x519   :  { %v296_v20 = vmul.f32 %v1453_v19, %v294_v18  ;;  %vm301_vm10 = vweird.f32 %v1453_v19 }
 0x51a   :  { %vm302_vm12 = vmor %vm300_vm11, %vm301_vm10 }
 0x51b   :  { %v297_v21 = vsub.f32 1.0, %v296_v20 }
 0x51d   :  { %v298_v22 = vmul.f32 %v1453_v19, %v297_v21 }
 0x51f   :  { %v299_v23 = vadd.f32 %v1453_v19, %v298_v22 }
 0x521   :  { %v303_v26 = vsel %vm302_vm12, %v1453_v19, %v299_v23 }
 0x522   :  { %v308_v29 = vsel %vm305_vm13, %v307_v27, %v303_v26 }
 0x523   :  { %v322_v34 = vsub.f32 1.0, %v308_v29  ;;  %v328_v37 = vmul.f32 %v308_v29, %v1664_v3 }
 0x579   :  { %v313_v28 = vpop.permute.xlu0 %312 }
 0x57a   :  { %v315_v30 = vmul.f32 %v313_v28, %v308_v29 }
 0x57c   :  { %317 = vrot.lane.b32.xlu1 %v315_v30, %s1539_s27 }
 0x58b   :  { %v111_v17 = vpop.f32.mrf.mxu0 }
 0x58c   :  { %v112_v18 = vadd.f32 %v1645_v10, %v111_v17 }
 0x5ee   :  { %v318_v31 = vpop.permute.xlu1 %317 }
 0x5ef   :  { %v320_v32 = vadd.f32 %v318_v31, %v107_v14 }
 0x5f1   :  { %1454 = vtanh.f32 %v320_v32 }
 0x5f7   :  { %v1455_v33 = vpop.eup %1454 }
 0x5f8   :  { %324 = vrot.lane.b32.xlu2 %v1455_v33, %s1541_s4 }
 0x652   :  { %v325_v35 = vpop.permute.xlu2 %324 }
 0x653   :  { %v327_v38 = vmul.f32 %v325_v35, %v322_v34 }
 0x655   :  { %v1680_v39 = vadd.f32 %v328_v37, %v327_v38 }
 0x657   :  { %v335_v40 = vpack.c.bf16 %v1680_v39, %v1680_v39 }
 0x659   :  { %337 = vrot.lane.b32.xlu0 %v335_v40, %s1541_s4 }
 0x6cb   :  { %v338_v41 = vpop.permute.xlu0 %337 }
 0x6cc   :  { %1363 = vmatmul.msk.bf16.vlgmr.msrb.gmra.mxu1 %vm140_vm5, %v338_v41 }
 0x749   :  { %v351_v42 = vpop.f32.mrf.mxu1 }
 0x74a   :  { %v375_v43 = vadd.f32 %v351_v42, %v1638_v6  ;;  %v355_v47 = vadd.f32 %v351_v42, %v109_v46 }
 0x74c   :  { %377 = vrot.lane.b32.xlu1 %v375_v43, %s1539_s27  ;;  %v1364_v48 = vmul.f32 -1.442695, %v355_v47 }
 0x74e   :  { %1456 = vpow2.f32 %v1364_v48 }
 0x751   :  { %v353_v44 = vpop.f32.mrf.mxu1 }
 0x754   :  { %v1457_v49 = vpop.eup %1456 }
 0x755   :  { %v359_v50 = vadd.f32 1.0, %v1457_v49 }
 0x757   :  { %1458 = vrcp.f32 %v359_v50  ;;  %v371_v56 = vand.u32 2147483648, %v359_v50  ;;  %vm365_vm15 = vweird.f32 %v359_v50  ;;  %v369_v57 = vand.u32 2147483647, %v359_v50 }
 0x759   :  { %v372_v59 = vor.u32 1.1754944e-38, %v371_v56  ;;  %vm370_vm2 = vcmp.eq.f32.partialorder %v369_v57, 8.507059e+37 }
 0x75d   :  { %v1459_v51 = vpop.eup %1458 }
 0x75e   :  { %v361_v52 = vmul.f32 %v1459_v51, %v359_v50  ;;  %vm366_vm14 = vweird.f32 %v1459_v51  ;;  %v113_v50 = vpop.f32.mrf.mxu0 }
 0x75f   :  { %vm367_vm1 = vmor %vm365_vm15, %vm366_vm14 }
 0x760   :  { %v362_v53 = vsub.f32 1.0, %v361_v52 }
 0x762   :  { %v363_v54 = vmul.f32 %v1459_v51, %v362_v53 }
 0x764   :  { %v364_v55 = vadd.f32 %v1459_v51, %v363_v54 }
 0x766   :  { %v368_v58 = vsel %vm367_vm1, %v1459_v51, %v364_v55  ;;  %v114_v51 = vadd.f32 %v1645_v10, %v113_v50 }
 0x767   :  { %v373_v61 = vsel %vm370_vm2, %v372_v59, %v368_v58 }
 0x768   :  { %v387_v2 = vsub.f32 1.0, %v373_v61  ;;  %v393_v7 = vmul.f32 %v373_v61, %v1680_v39 }
 0x7be   :  { %v378_v60 = vpop.permute.xlu1 %377 }
 0x7bf   :  { %v380_v62 = vmul.f32 %v378_v60, %v373_v61 }
 0x7c1   :  { %382 = vrot.lane.b32.xlu2 %v380_v62, %s1539_s27 }
 0x81b   :  { %v383_v63 = vpop.permute.xlu2 %382 }
 0x81c   :  { %v385_v0 = vadd.f32 %v383_v63, %v109_v46 }
 0x81e   :  { %1460 = vtanh.f32 %v385_v0 }
 0x824   :  { %v1461_v1 = vpop.eup %1460 }
 0x825   :  { %389 = vrot.lane.b32.xlu0 %v1461_v1, %s1541_s4 }
 0x897   :  { %v390_v4 = vpop.permute.xlu0 %389 }
 0x898   :  { %v392_v8 = vmul.f32 %v390_v4, %v387_v2 }
 0x89a   :  { %v1692_v9 = vadd.f32 %v393_v7, %v392_v8 }
 0x89c   :  { %v400_v11 = vpack.c.bf16 %v1692_v9, %v1692_v9 }
 0x89e   :  { %402 = vrot.lane.b32.xlu1 %v400_v11, %s1541_s4 }
 0x910   :  { %v403_v13 = vpop.permute.xlu1 %402 }
 0x911   :  { %1365 = vmatmul.msk.bf16.vlgmr.msrb.gmra.mxu2 %vm140_vm5, %v403_v13  ;;  %v1425_v13 = vld [vmem:[%s1962_s5 + $0x8] sm:$0xff] }
 0x912   :  { %710 = vmatpush.bf16.msra.mxu3 %v1425_v13 }
 0x994   :  { %v416_v14 = vpop.f32.mrf.mxu2 }
 0x995   :  { %v440_v15 = vadd.f32 %v416_v14, %v1638_v6  ;;  %v420_v19 = vadd.f32 %v416_v14, %v112_v18  ;;  %v1420_v14 = vld [vmem:[%s1959_s0 + $0x18] sm:$0xff] }
 0x996   :  { %1349 = vmatmul.msk.bf16.gmra.mxu0 %vm79_vm0, %v1420_v14 }
 0x997   :  { %442 = vrot.lane.b32.xlu2 %v440_v15, %s1539_s27  ;;  %v1366_v20 = vmul.f32 -1.442695, %v420_v19 }
 0x999   :  { %1462 = vpow2.f32 %v1366_v20 }
 0x99c   :  { %v418_v16 = vpop.f32.mrf.mxu2 }
 0x99f   :  { %v1463_v21 = vpop.eup %1462 }
 0x9a0   :  { %v424_v22 = vadd.f32 1.0, %v1463_v21 }
 0x9a2   :  { %1464 = vrcp.f32 %v424_v22  ;;  %v436_v28 = vand.u32 2147483648, %v424_v22  ;;  %vm430_vm4 = vweird.f32 %v424_v22  ;;  %v434_v29 = vand.u32 2147483647, %v424_v22 }
 0x9a4   :  { %v437_v31 = vor.u32 1.1754944e-38, %v436_v28  ;;  %vm435_vm7 = vcmp.eq.f32.partialorder %v434_v29, 8.507059e+37 }
 0x9a8   :  { %v1465_v23 = vpop.eup %1464 }
 0x9a9   :  { %v426_v24 = vmul.f32 %v1465_v23, %v424_v22  ;;  %vm431_vm3 = vweird.f32 %v1465_v23 }
 0x9aa   :  { %vm432_vm6 = vmor %vm430_vm4, %vm431_vm3 }
 0x9ab   :  { %v427_v25 = vsub.f32 1.0, %v426_v24  ;;  %v1745_v24 = vld [vmem:[%s1965_s6 + $0x8] sm:$0xff] }
 0x9ac   :  { %758 = vmatpush.bf16.msrb.mxu1 %v1745_v24  ;;  %826 = vmatpush.bf16.msrb.mxu2 %v1745_v24 }
 0x9ad   :  { %v428_v26 = vmul.f32 %v1465_v23, %v427_v25  ;;  %v1751_v25 = vld [vmem:[%s1965_s6] sm:$0xff]  ;;  %891 = vmatpush.bf16.msrb.mxu0 %v1745_v24 }
 0x9af   :  { %v429_v27 = vadd.f32 %v1465_v23, %v428_v26  ;;  %v1435_v26 = vld [vmem:[%s1963_s8] ss:$0 sm:$0xff] }
 0x9b0   :  { %759 = vmatpush.bf16.msrb.mxu1 %v1751_v25  ;;  %827 = vmatpush.bf16.msrb.mxu2 %v1751_v25 }
 0x9b1   :  { %v433_v30 = vsel %vm432_vm6, %v1465_v23, %v429_v27  ;;  %892 = vmatpush.bf16.msrb.mxu0 %v1751_v25 }
 0x9b2   :  { %v438_v33 = vsel %vm435_vm7, %v437_v31, %v433_v30 }
 0x9b3   :  { %v452_v40 = vsub.f32 1.0, %v438_v33  ;;  %v458_v42 = vmul.f32 %v438_v33, %v1692_v9 }
 0x9b5   :  { %1086 = vmatpush.bf16.msra.mxu0 %v1745_v24 }
 0x9b9   :  { %1087 = vmatpush.bf16.msra.mxu0 %v1751_v25 }
 0x9f1   :  { %v443_v32 = vpop.permute.xlu2 %442 }
 0x9f2   :  { %v445_v34 = vmul.f32 %v443_v32, %v438_v33 }
 0x9f4   :  { %447 = vrot.lane.b32.xlu0 %v445_v34, %s1539_s27 }
 0xa66   :  { %v448_v35 = vpop.permute.xlu0 %447 }
 0xa67   :  { %v450_v37 = vadd.f32 %v448_v35, %v112_v18 }
 0xa69   :  { %1466 = vtanh.f32 %v450_v37 }
 0xa6f   :  { %v1467_v38 = vpop.eup %1466 }
 0xa70   :  { %454 = vrot.lane.b32.xlu1 %v1467_v38, %s1541_s4 }
 0xae2   :  { %v455_v41 = vpop.permute.xlu1 %454 }
 0xae3   :  { %v457_v43 = vmul.f32 %v455_v41, %v452_v40  ;;  %v116_v40 = vpop.f32.mrf.mxu0 }
 0xae4   :  { %v117_v41 = vadd.f32 %v1645_v10, %v116_v40 }
 0xae5   :  { %v1708_v44 = vadd.f32 %v458_v42, %v457_v43 }
 0xae7   :  { %v465_v45 = vpack.c.bf16 %v1708_v44, %v1708_v44 }
 0xae9   :  { %467 = vrot.lane.b32.xlu2 %v465_v45, %s1541_s4 }
 0xb43   :  { %v468_v46 = vpop.permute.xlu2 %467 }
 0xb44   :  { %1367 = vmatmul.msk.bf16.vlgmr.msrb.gmra.mxu3 %vm140_vm5, %v468_v46 }
 0xbc7   :  { %v481_v47 = vpop.f32.mrf.mxu3 }
 0xbc8   :  { %v505_v48 = vadd.f32 %v481_v47, %v1638_v6  ;;  %v485_v52 = vadd.f32 %v481_v47, %v114_v51 }
 0xbca   :  { %507 = vrot.lane.b32.xlu0 %v505_v48, %s1539_s27  ;;  %v1368_v53 = vmul.f32 -1.442695, %v485_v52 }
 0xbcc   :  { %1468 = vpow2.f32 %v1368_v53 }
 0xbcf   :  { %v483_v49 = vpop.f32.mrf.mxu3 }
 0xbd2   :  { %v1469_v54 = vpop.eup %1468 }
 0xbd3   :  { %v489_v55 = vadd.f32 1.0, %v1469_v54 }
 0xbd5   :  { %1470 = vrcp.f32 %v489_v55  ;;  %v501_v61 = vand.u32 2147483648, %v489_v55  ;;  %vm495_vm9 = vweird.f32 %v489_v55  ;;  %v499_v62 = vand.u32 2147483647, %v489_v55 }
 0xbd7   :  { %v502_v0 = vor.u32 1.1754944e-38, %v501_v61  ;;  %vm500_vm11 = vcmp.eq.f32.partialorder %v499_v62, 8.507059e+37 }
 0xbdb   :  { %v1471_v56 = vpop.eup %1470 }
 0xbdc   :  { %v491_v57 = vmul.f32 %v1471_v56, %v489_v55  ;;  %vm496_vm8 = vweird.f32 %v1471_v56 }
 0xbdd   :  { %vm497_vm10 = vmor %vm495_vm9, %vm496_vm8 }
 0xbde   :  { %v492_v58 = vsub.f32 1.0, %v491_v57 }
 0xbe0   :  { %v493_v59 = vmul.f32 %v1471_v56, %v492_v58 }
 0xbe2   :  { %v494_v60 = vadd.f32 %v1471_v56, %v493_v59 }
 0xbe4   :  { %v498_v63 = vsel %vm497_vm10, %v1471_v56, %v494_v60 }
 0xbe5   :  { %v503_v2 = vsel %vm500_vm11, %v502_v0, %v498_v63 }
 0xbe6   :  { %v517_v15 = vsub.f32 1.0, %v503_v2 }
 0xc3c   :  { %v508_v1 = vpop.permute.xlu0 %507 }
 0xc3d   :  { %v510_v4 = vmul.f32 %v508_v1, %v503_v2 }
 0xc3f   :  { %512 = vrot.lane.b32.xlu1 %v510_v4, %s1539_s27 }
 0xc47   :  { %201 = vrot.lane.b32.xlu1 %v1650_v36, %s1541_s4  ;;  %v1424_v36 = vld [vmem:[%s1962_s5] sm:$0xff] }
 0xc48   :  { %711 = vmatpush.bf16.msra.mxu3 %v1424_v36 }
 0xcb1   :  { %v513_v7 = vpop.permute.xlu1 %512 }
 0xcb2   :  { %v515_v8 = vadd.f32 %v513_v7, %v114_v51 }
 0xcb4   :  { %1472 = vtanh.f32 %v515_v8 }
 0xcb9   :  { %v202_v11 = vpop.permute.xlu1 %201 }
 0xcba   :  { %v1473_v12 = vpop.eup %1472  ;;  %204 = vst.msk [vmem:[#allocation2] sm:$0xff] %vm140_vm5, %v202_v11 }
 0xcbb   :  { %519 = vrot.lane.b32.xlu2 %v1473_v12, %s1541_s4 }
 0xcc1   :  { %v660_v21 = vld [vmem:[#allocation2] sm:$0xff] }
 0xcc3   :  { %266 = vrot.lane.b32.xlu2 %v1664_v3, %s1541_s4  ;;  %v523_v3 = vmul.f32 %v503_v2, %v1708_v44 }
 0xd15   :  { %v520_v16 = vpop.permute.xlu2 %519 }
 0xd16   :  { %v522_v17 = vmul.f32 %v520_v16, %v517_v15 }
 0xd18   :  { %v1735_v18 = vadd.f32 %v523_v3, %v522_v17 }
 0xd1a   :  { %v530_v19 = vpack.c.bf16 %v1735_v18, %v1735_v18 }
 0xd1c   :  { %532 = vrot.lane.b32.xlu0 %v530_v19, %s1541_s4 }
 0xd1d   :  { %v267_v20 = vpop.permute.xlu2 %266 }
 0xd1e   :  { %269 = vst.msk [vmem:[#allocation2 + $0x8] sm:$0xff] %vm140_vm5, %v267_v20 }
 0xd24   :  { %785 = vrot.lane.b32.xlu0 %v1435_v26, %s1539_s27 }
 0xd25   :  { %v661_v22 = vld [vmem:[#allocation2 + $0x8] sm:$0xff] }
 0xd26   :  { %v668_v23 = vpack.c.bf16 %v661_v22, %v660_v21 }
 0xd28   :  { %1381 = vmatmul.msk.bf16.vlgmr.msra.gmra.mxu3 %vm140_vm5, %v668_v23 }
 0xd8e   :  { %v533_v27 = vpop.permute.xlu0 %532 }
 0xd8f   :  { %1369 = vmatmul.msk.bf16.vlgmr.msra.gmra.mxu1 %vm140_vm5, %v533_v27 }
 0xd90   :  { %956 = vmatpush.bf16.msra.mxu1 %v1745_v24 }
 0xd94   :  { %957 = vmatpush.bf16.msra.mxu1 %v1751_v25 }
 0xd96   :  { %v1772_v31 = vpop.permute.xlu0 %785 }
 0xd9f   :  { %760 = vmatmul.bf16.vlgmr.msrb.gmra.mxu1 %v1540_v5  ;;  %v1779_v5 = vld [vmem:[%s1964_s7] ss:$0 sm:$0xff] }
 0xda0   :  { %1151 = vmatpush.bf16.msrb.mxu1 %v1745_v24 }
 0xda4   :  { %1152 = vmatpush.bf16.msrb.mxu1 %v1751_v25 }
 0xdab   :  { %v713_v35 = vpop.f32.mrf.mxu3 }
 0xdac   :  { %v714_v37 = vadd.f32 %v1779_v5, %v713_v35 }
 0xe0c   :  { %v546_v28 = vpop.f32.mrf.mxu1 }
 0xe0d   :  { %v570_v29 = vadd.f32 %v546_v28, %v1638_v6  ;;  %v550_v43 = vadd.f32 %v546_v28, %v117_v41 }
 0xe0f   :  { %572 = vrot.lane.b32.xlu1 %v570_v29, %s1539_s27  ;;  %v1370_v45 = vmul.f32 -1.442695, %v550_v43  ;;  %v715_v43 = vpop.f32.mrf.mxu3 }
 0xe14   :  { %v548_v30 = vpop.f32.mrf.mxu1 }
 0xe1c   :  { %v761_v32 = vpop.f32.mrf.mxu1 }
 0xe1d   :  { %v788_v33 = vadd.f32 %v1772_v31, %v761_v32  ;;  %v765_v38 = vadd.f32 %v761_v32, %v714_v37 }
 0xe1f   :  { %790 = vrot.lane.b32.xlu2 %v788_v33, %s1539_s27  ;;  %v1393_v42 = vmul.f32 -1.442695, %v765_v38 }
 0xe21   :  { %1474 = vpow2.f32 %v1393_v42 }
 0xe22   :  { %1476 = vpow2.f32 %v1370_v45  ;;  %v716_v45 = vadd.f32 %v1779_v5, %v715_v43 }
 0xe24   :  { %v763_v34 = vpop.f32.mrf.mxu1 }
 0xe27   :  { %v1475_v46 = vpop.eup %1474 }
 0xe28   :  { %v769_v47 = vadd.f32 1.0, %v1475_v46  ;;  %v1477_v48 = vpop.eup %1476 }
 0xe29   :  { %v554_v49 = vadd.f32 1.0, %v1477_v48 }
 0xe2a   :  { %1478 = vrcp.f32 %v769_v47  ;;  %v781_v57 = vand.u32 2147483648, %v769_v47  ;;  %vm775_vm12 = vweird.f32 %v769_v47  ;;  %v779_v58 = vand.u32 2147483647, %v769_v47 }
 0xe2b   :  { %1480 = vrcp.f32 %v554_v49  ;;  %v566_v2 = vand.u32 2147483648, %v554_v49  ;;  %vm560_vm1 = vweird.f32 %v554_v49  ;;  %v564_v4 = vand.u32 2147483647, %v554_v49 }
 0xe2c   :  { %v782_v61 = vor.u32 1.1754944e-38, %v781_v57  ;;  %vm780_vm14 = vcmp.eq.f32.partialorder %v779_v58, 8.507059e+37 }
 0xe2d   :  { %v567_v8 = vor.u32 1.1754944e-38, %v566_v2  ;;  %vm565_vm3 = vcmp.eq.f32.partialorder %v564_v4, 8.507059e+37 }
 0xe30   :  { %v1479_v50 = vpop.eup %1478 }
 0xe31   :  { %v771_v51 = vmul.f32 %v1479_v50, %v769_v47  ;;  %v1481_v53 = vpop.eup %1480  ;;  %vm776_vm0 = vweird.f32 %v1479_v50 }
 0xe32   :  { %v556_v55 = vmul.f32 %v1481_v53, %v554_v49  ;;  %vm777_vm13 = vmor %vm775_vm12, %vm776_vm0  ;;  %vm561_vm15 = vweird.f32 %v1481_v53 }
 0xe33   :  { %v772_v52 = vsub.f32 1.0, %v771_v51  ;;  %vm562_vm2 = vmor %vm560_vm1, %vm561_vm15 }
 0xe34   :  { %v557_v10 = vsub.f32 1.0, %v556_v55 }
 0xe35   :  { %v773_v54 = vmul.f32 %v1479_v50, %v772_v52 }
 0xe36   :  { %v558_v60 = vmul.f32 %v1481_v53, %v557_v10 }
 0xe37   :  { %v774_v56 = vadd.f32 %v1479_v50, %v773_v54 }
 0xe38   :  { %v559_v1 = vadd.f32 %v1481_v53, %v558_v60 }
 0xe39   :  { %v778_v59 = vsel %vm777_vm13, %v1479_v50, %v774_v56 }
 0xe3a   :  { %v783_v63 = vsel %vm780_vm14, %v782_v61, %v778_v59  ;;  %v563_v7 = vsel %vm562_vm2, %v1481_v53, %v559_v1 }
 0xe3b   :  { %v568_v11 = vsel %vm565_vm3, %v567_v8, %v563_v7  ;;  %v800_v27 = vsub.f32 1.0, %v783_v63  ;;  %v806_v29 = vmul.f32 0.0, %v783_v63 }
 0xe3c   :  { %v582_v19 = vsub.f32 1.0, %v568_v11  ;;  %v588_v21 = vmul.f32 %v568_v11, %v1735_v18 }
 0xe79   :  { %v791_v62 = vpop.permute.xlu2 %790 }
 0xe7a   :  { %v793_v0 = vmul.f32 %v791_v62, %v783_v63 }
 0xe7c   :  { %795 = vrot.lane.b32.xlu1 %v793_v0, %s1539_s27 }
 0xe81   :  { %v573_v12 = vpop.permute.xlu1 %572 }
 0xe82   :  { %v575_v13 = vmul.f32 %v573_v12, %v568_v11 }
 0xe84   :  { %577 = vrot.lane.b32.xlu0 %v575_v13, %s1539_s27  ;;  %v1825_v13 = vpop.f32.mrf.mxu0 }
 0xeee   :  { %v796_v36 = vpop.permute.xlu1 %795 }
 0xeef   :  { %v798_v14 = vadd.f32 %v796_v36, %v714_v37 }
 0xef1   :  { %1482 = vtanh.f32 %v798_v14 }
 0xef6   :  { %v578_v15 = vpop.permute.xlu0 %577 }
 0xef7   :  { %v1483_v16 = vpop.eup %1482  ;;  %v580_v3 = vadd.f32 %v578_v15, %v117_v41 }
 0xef8   :  { %802 = vrot.lane.b32.xlu0 %v1483_v16, %s1541_s4 }
 0xef9   :  { %1484 = vtanh.f32 %v580_v3 }
 0xeff   :  { %v1485_v17 = vpop.eup %1484 }
 0xf00   :  { %584 = vrot.lane.b32.xlu2 %v1485_v17, %s1541_s4 }
 0xf5a   :  { %v585_v20 = vpop.permute.xlu2 %584 }
 0xf5b   :  { %v587_v22 = vmul.f32 %v585_v20, %v582_v19 }
 0xf5d   :  { %v1788_v23 = vadd.f32 %v588_v21, %v587_v22 }
 0xf5f   :  { %v595_v26 = vpack.c.bf16 %v1788_v23, %v1788_v23 }
 0xf61   :  { %597 = vrot.lane.b32.xlu1 %v595_v26, %s1541_s4 }
 0xf6a   :  { %v803_v28 = vpop.permute.xlu0 %802 }
 0xf6b   :  { %v805_v30 = vmul.f32 %v803_v28, %v800_v27 }
 0xf6d   :  { %v1793_v32 = vadd.f32 %v806_v29, %v805_v30 }
 0xf6f   :  { %v813_v33 = vpack.c.bf16 %v1793_v32, %v1793_v32 }
 0xf71   :  { %815 = vrot.lane.b32.xlu2 %v813_v33, %s1541_s4 }
 0xfcb   :  { %v816_v35 = vpop.permute.xlu2 %815 }
 0xfd3   :  { %v598_v34 = vpop.permute.xlu1 %597 }
 0xfd4   :  { %1371 = vmatmul.msk.bf16.vlgmr.msra.gmra.mxu2 %vm140_vm5, %v598_v34 }
 0xfd5   :  { %1021 = vmatpush.bf16.msra.mxu2 %v1745_v24 }
 0xfd9   :  { %1022 = vmatpush.bf16.msra.mxu2 %v1751_v25 }
 0xfe4   :  { %1394 = vmatmul.msk.bf16.vlgmr.msrb.gmra.mxu2 %vm140_vm5, %v816_v35 }
 0xfe5   :  { %1216 = vmatpush.bf16.msrb.mxu2 %v1745_v24 }
 0xfe9   :  { %1217 = vmatpush.bf16.msrb.mxu2 %v1751_v25 }
0x1057   :  { %v1804_v37 = vpop.f32.mrf.mxu2 }
0x105f   :  { %v613_v38 = vpop.f32.mrf.mxu2 }
0x1067   :  { %v829_v40 = vpop.f32.mrf.mxu2 }
0x1068   :  { %v853_v41 = vadd.f32 %v829_v40, %v1772_v31  ;;  %v833_v46 = vadd.f32 %v829_v40, %v716_v45 }
0x106a   :  { %855 = vrot.lane.b32.xlu0 %v853_v41, %s1539_s27  ;;  %v1395_v47 = vmul.f32 -1.442695, %v833_v46 }
0x106c   :  { %1486 = vpow2.f32 %v1395_v47 }
0x106f   :  { %v831_v42 = vpop.f32.mrf.mxu2 }
0x1072   :  { %331 = vrot.lane.b32.xlu0 %v1680_v39, %s1541_s4  ;;  %v1487_v24 = vpop.eup %1486 }
0x1073   :  { %v837_v25 = vadd.f32 1.0, %v1487_v24 }
0x1075   :  { %1488 = vrcp.f32 %v837_v25  ;;  %v849_v53 = vand.u32 2147483648, %v837_v25  ;;  %vm843_vm6 = vweird.f32 %v837_v25  ;;  %v847_v54 = vand.u32 2147483647, %v837_v25 }
0x1077   :  { %v850_v55 = vor.u32 1.1754944e-38, %v849_v53  ;;  %vm848_vm8 = vcmp.eq.f32.partialorder %v847_v54, 8.507059e+37 }
0x107b   :  { %v1489_v48 = vpop.eup %1488 }
0x107c   :  { %v839_v49 = vmul.f32 %v1489_v48, %v837_v25  ;;  %vm844_vm4 = vweird.f32 %v1489_v48 }
0x107d   :  { %vm845_vm7 = vmor %vm843_vm6, %vm844_vm4 }
0x107e   :  { %v840_v50 = vsub.f32 1.0, %v839_v49 }
0x1080   :  { %v841_v51 = vmul.f32 %v1489_v48, %v840_v50 }
0x1082   :  { %v842_v52 = vadd.f32 %v1489_v48, %v841_v51 }
0x1084   :  { %v846_v39 = vsel %vm845_vm7, %v1489_v48, %v842_v52 }
0x1085   :  { %v851_v10 = vsel %vm848_vm8, %v850_v55, %v846_v39 }
0x1086   :  { %v865_v2 = vsub.f32 1.0, %v851_v10  ;;  %v871_v7 = vmul.f32 %v851_v10, %v1793_v32 }
0x10dc   :  { %v856_v56 = vpop.permute.xlu0 %855 }
0x10dd   :  { %v858_v57 = vmul.f32 %v856_v56, %v851_v10 }
0x10df   :  { %860 = vrot.lane.b32.xlu1 %v858_v57, %s1539_s27 }
0x10e4   :  { %v332_v58 = vpop.permute.xlu0 %331 }
0x10e5   :  { %334 = vst.msk [vmem:[#allocation2 + $0x10] sm:$0xff] %vm140_vm5, %v332_v58 }
0x10e7   :  { %396 = vrot.lane.b32.xlu1 %v1692_v9, %s1541_s4 }
0x10ec   :  { %v662_v63 = vld [vmem:[#allocation2 + $0x10] sm:$0xff] }
0x1151   :  { %v861_v59 = vpop.permute.xlu1 %860 }
0x1152   :  { %v863_v60 = vadd.f32 %v861_v59, %v716_v45 }
0x1154   :  { %1490 = vtanh.f32 %v863_v60 }
0x1159   :  { %v397_v61 = vpop.permute.xlu1 %396 }
0x115a   :  { %v1491_v62 = vpop.eup %1490  ;;  %399 = vst.msk [vmem:[#allocation2 + $0x18] sm:$0xff] %vm140_vm5, %v397_v61 }
0x115b   :  { %867 = vrot.lane.b32.xlu2 %v1491_v62, %s1541_s4 }
0x1161   :  { %v663_v0 = vld [vmem:[#allocation2 + $0x18] sm:$0xff] }
0x1162   :  { %v669_v1 = vpack.c.bf16 %v663_v0, %v662_v63 }
0x1164   :  { %1382 = vmatmul.msk.bf16.gmra.mxu3 %vm140_vm5, %v669_v1 }
0x11b5   :  { %v868_v4 = vpop.permute.xlu2 %867 }
0x11b6   :  { %v870_v8 = vmul.f32 %v868_v4, %v865_v2 }
0x11b8   :  { %v1819_v9 = vadd.f32 %v871_v7, %v870_v8 }
0x11ba   :  { %v878_v11 = vpack.c.bf16 %v1819_v9, %v1819_v9 }
0x11bc   :  { %880 = vrot.lane.b32.xlu2 %v878_v11, %s1541_s4 }
0x11e7   :  { %v718_v16 = vpop.f32.mrf.mxu3 }
0x11e8   :  { %v719_v3 = vadd.f32 %v1779_v5, %v718_v16 }
0x11ef   :  { %v720_v54 = vpop.f32.mrf.mxu3 }
0x11f0   :  { %v721_v39 = vadd.f32 %v1779_v5, %v720_v54 }
0x1216   :  { %v881_v12 = vpop.permute.xlu2 %880 }
0x1217   :  { %1396 = vmatmul.msk.bf16.vlgmr.msrb.gmra.mxu0 %vm140_vm5, %v881_v12 }
0x1294   :  { %v894_v36 = vpop.f32.mrf.mxu0 }
0x1295   :  { %v918_v14 = vadd.f32 %v894_v36, %v1772_v31  ;;  %v898_v17 = vadd.f32 %v894_v36, %v719_v3 }
0x1297   :  { %920 = vrot.lane.b32.xlu0 %v918_v14, %s1539_s27  ;;  %v1397_v19 = vmul.f32 -1.442695, %v898_v17 }
0x1299   :  { %1492 = vpow2.f32 %v1397_v19 }
0x129c   :  { %v896_v15 = vpop.f32.mrf.mxu0 }
0x129f   :  { %v1493_v20 = vpop.eup %1492 }
0x12a0   :  { %v902_v21 = vadd.f32 1.0, %v1493_v20 }
0x12a2   :  { %1494 = vrcp.f32 %v902_v21  ;;  %v914_v30 = vand.u32 2147483648, %v902_v21  ;;  %vm908_vm10 = vweird.f32 %v902_v21  ;;  %v912_v33 = vand.u32 2147483647, %v902_v21 }
0x12a4   :  { %v915_v35 = vor.u32 1.1754944e-38, %v914_v30  ;;  %vm913_vm0 = vcmp.eq.f32.partialorder %v912_v33, 8.507059e+37 }
0x12a8   :  { %v1495_v22 = vpop.eup %1494 }
0x12a9   :  { %v904_v26 = vmul.f32 %v1495_v22, %v902_v21  ;;  %vm909_vm9 = vweird.f32 %v1495_v22 }
0x12aa   :  { %vm910_vm11 = vmor %vm908_vm10, %vm909_vm9 }
0x12ab   :  { %v905_v27 = vsub.f32 1.0, %v904_v26 }
0x12ad   :  { %v906_v28 = vmul.f32 %v1495_v22, %v905_v27 }
0x12af   :  { %v907_v29 = vadd.f32 %v1495_v22, %v906_v28 }
0x12b1   :  { %v911_v34 = vsel %vm910_vm11, %v1495_v22, %v907_v29 }
0x12b2   :  { %v916_v40 = vsel %vm913_vm0, %v915_v35, %v911_v34 }
0x12b3   :  { %v930_v46 = vsub.f32 1.0, %v916_v40  ;;  %v936_v24 = vmul.f32 %v916_v40, %v1819_v9 }
0x1309   :  { %v921_v38 = vpop.permute.xlu0 %920 }
0x130a   :  { %v923_v41 = vmul.f32 %v921_v38, %v916_v40 }
0x130c   :  { %925 = vrot.lane.b32.xlu1 %v923_v41, %s1539_s27 }
0x137e   :  { %v926_v42 = vpop.permute.xlu1 %925 }
0x137f   :  { %v928_v43 = vadd.f32 %v926_v42, %v719_v3 }
0x1381   :  { %1496 = vtanh.f32 %v928_v43 }
0x1387   :  { %v1497_v45 = vpop.eup %1496 }
0x1388   :  { %932 = vrot.lane.b32.xlu2 %v1497_v45, %s1541_s4 }
0x13e2   :  { %v933_v47 = vpop.permute.xlu2 %932 }
0x13e3   :  { %v935_v25 = vmul.f32 %v933_v47, %v930_v46 }
0x13e5   :  { %v1833_v48 = vadd.f32 %v936_v24, %v935_v25 }
0x13e7   :  { %v943_v49 = vpack.c.bf16 %v1833_v48, %v1833_v48 }
0x13e9   :  { %945 = vrot.lane.b32.xlu0 %v943_v49, %s1541_s4 }
0x145b   :  { %v946_v50 = vpop.permute.xlu0 %945 }
0x145c   :  { %1398 = vmatmul.msk.bf16.vlgmr.msra.gmra.mxu1 %vm140_vm5, %v946_v50 }
0x14d9   :  { %v959_v51 = vpop.f32.mrf.mxu1 }
0x14da   :  { %v983_v52 = vadd.f32 %v959_v51, %v1772_v31  ;;  %v963_v55 = vadd.f32 %v959_v51, %v721_v39 }
0x14dc   :  { %985 = vrot.lane.b32.xlu1 %v983_v52, %s1539_s27  ;;  %v1399_v56 = vmul.f32 -1.442695, %v963_v55 }
0x14de   :  { %1498 = vpow2.f32 %v1399_v56  ;;  %v1538_v56 = vld [vmem:[%s1961_s3] ss:$0 sm:$0xff] }
0x14e1   :  { %v961_v53 = vpop.f32.mrf.mxu1 }
0x14e2   :  { %v635_v53 = vadd.f32 %v1804_v37, %v1638_v6 }
0x14e4   :  { %461 = vrot.lane.b32.xlu1 %v1708_v44, %s1541_s4  ;;  %v1499_v10 = vpop.eup %1498 }
0x14e5   :  { %v967_v57 = vadd.f32 1.0, %v1499_v10  ;;  %v119_v10 = vadd.f32 %v1538_v56, %v1825_v13 }
0x14e7   :  { %1500 = vrcp.f32 %v967_v57  ;;  %v979_v63 = vand.u32 2147483648, %v967_v57  ;;  %vm973_vm13 = vweird.f32 %v967_v57  ;;  %v977_v0 = vand.u32 2147483647, %v967_v57 }
0x14e9   :  { %v980_v1 = vor.u32 1.1754944e-38, %v979_v63  ;;  %vm978_vm15 = vcmp.eq.f32.partialorder %v977_v0, 8.507059e+37 }
0x14ed   :  { %v1501_v58 = vpop.eup %1500 }
0x14ee   :  { %v969_v59 = vmul.f32 %v1501_v58, %v967_v57  ;;  %vm974_vm12 = vweird.f32 %v1501_v58  ;;  %v615_v57 = vadd.f32 %v1804_v37, %v119_v10 }
0x14ef   :  { %vm975_vm14 = vmor %vm973_vm13, %vm974_vm12 }
0x14f0   :  { %v970_v60 = vsub.f32 1.0, %v969_v59 }
0x14f2   :  { %v971_v61 = vmul.f32 %v1501_v58, %v970_v60 }
0x14f4   :  { %v972_v62 = vadd.f32 %v1501_v58, %v971_v61 }
0x14f6   :  { %v976_v44 = vsel %vm975_vm14, %v1501_v58, %v972_v62  ;;  %v1372_v58 = vmul.f32 -1.442695, %v615_v57 }
0x14f7   :  { %v981_v4 = vsel %vm978_vm15, %v980_v1, %v976_v44 }
0x14f8   :  { %v995_v17 = vsub.f32 1.0, %v981_v4  ;;  %v1001_v20 = vmul.f32 %v981_v4, %v1833_v48 }
0x154e   :  { %v986_v2 = vpop.permute.xlu1 %985 }
0x154f   :  { %v988_v7 = vmul.f32 %v986_v2, %v981_v4 }
0x1551   :  { %990 = vrot.lane.b32.xlu2 %v988_v7, %s1539_s27 }
0x1556   :  { %v462_v8 = vpop.permute.xlu1 %461 }
0x1557   :  { %464 = vst.msk [vmem:[#allocation2 + $0x20] sm:$0xff] %vm140_vm5, %v462_v8 }
0x1559   :  { %526 = vrot.lane.b32.xlu2 %v1735_v18, %s1541_s4 }
0x155e   :  { %v664_v15 = vld [vmem:[#allocation2 + $0x20] sm:$0xff] }
0x15ab   :  { %v991_v11 = vpop.permute.xlu2 %990 }
0x15ac   :  { %v993_v12 = vadd.f32 %v991_v11, %v721_v39 }
0x15ae   :  { %1502 = vtanh.f32 %v993_v12 }
0x15b3   :  { %v527_v36 = vpop.permute.xlu2 %526 }
0x15b4   :  { %v1503_v14 = vpop.eup %1502  ;;  %529 = vst.msk [vmem:[#allocation2 + $0x28] sm:$0xff] %vm140_vm5, %v527_v36 }
0x15b5   :  { %997 = vrot.lane.b32.xlu0 %v1503_v14, %s1541_s4 }
0x15bb   :  { %v665_v16 = vld [vmem:[#allocation2 + $0x28] sm:$0xff] }
0x15bc   :  { %v670_v3 = vpack.c.bf16 %v665_v16, %v664_v15 }
0x15be   :  { %1383 = vmatmul.msk.bf16.gmra.mxu3 %vm140_vm5, %v670_v3 }
0x1627   :  { %v998_v19 = vpop.permute.xlu0 %997 }
0x1628   :  { %v1000_v21 = vmul.f32 %v998_v19, %v995_v17 }
0x162a   :  { %v1852_v18 = vadd.f32 %v1001_v20, %v1000_v21 }
0x162c   :  { %v1008_v22 = vpack.c.bf16 %v1852_v18, %v1852_v18 }
0x162e   :  { %1010 = vrot.lane.b32.xlu0 %v1008_v22, %s1541_s4 }
0x1641   :  { %v723_v30 = vpop.f32.mrf.mxu3 }
0x1642   :  { %v724_v33 = vadd.f32 %v1779_v5, %v723_v30 }
0x16a0   :  { %v1011_v26 = vpop.permute.xlu0 %1010 }
0x16a1   :  { %1400 = vmatmul.msk.bf16.vlgmr.msra.gmra.mxu2 %vm140_vm5, %v1011_v26  ;;  %v725_v26 = vpop.f32.mrf.mxu3 }
0x1724   :  { %v1024_v27 = vpop.f32.mrf.mxu2 }
0x1725   :  { %v1048_v28 = vadd.f32 %v1024_v27, %v1772_v31  ;;  %v1028_v34 = vadd.f32 %v1024_v27, %v724_v33  ;;  %v726_v27 = vadd.f32 %v1779_v5, %v725_v26 }
0x1727   :  { %1050 = vrot.lane.b32.xlu1 %v1048_v28, %s1539_s27  ;;  %v1401_v35 = vmul.f32 -1.442695, %v1028_v34 }
0x1729   :  { %1504 = vpow2.f32 %v1401_v35 }
0x172c   :  { %v1026_v29 = vpop.f32.mrf.mxu2 }
0x172f   :  { %v1505_v38 = vpop.eup %1504 }
0x1730   :  { %v1032_v40 = vadd.f32 1.0, %v1505_v38 }
0x1732   :  { %1506 = vrcp.f32 %v1032_v40  ;;  %v1044_v47 = vand.u32 2147483648, %v1032_v40  ;;  %vm1038_vm2 = vweird.f32 %v1032_v40  ;;  %v1042_v24 = vand.u32 2147483647, %v1032_v40 }
0x1734   :  { %v1045_v49 = vor.u32 1.1754944e-38, %v1044_v47  ;;  %vm1043_vm4 = vcmp.eq.f32.partialorder %v1042_v24, 8.507059e+37 }
0x1738   :  { %v1507_v41 = vpop.eup %1506 }
0x1739   :  { %v1034_v42 = vmul.f32 %v1507_v41, %v1032_v40  ;;  %vm1039_vm1 = vweird.f32 %v1507_v41 }
0x173a   :  { %vm1040_vm3 = vmor %vm1038_vm2, %vm1039_vm1 }
0x173b   :  { %v1035_v43 = vsub.f32 1.0, %v1034_v42 }
0x173d   :  { %v1036_v45 = vmul.f32 %v1507_v41, %v1035_v43 }
0x173f   :  { %v1037_v46 = vadd.f32 %v1507_v41, %v1036_v45 }
0x1741   :  { %v1041_v25 = vsel %vm1040_vm3, %v1507_v41, %v1037_v46 }
0x1742   :  { %v1046_v51 = vsel %vm1043_vm4, %v1045_v49, %v1041_v25 }
0x1743   :  { %v1060_v63 = vsub.f32 1.0, %v1046_v51  ;;  %v1066_v1 = vmul.f32 %v1046_v51, %v1852_v18 }
0x1799   :  { %v1051_v50 = vpop.permute.xlu1 %1050 }
0x179a   :  { %v1053_v52 = vmul.f32 %v1051_v50, %v1046_v51 }
0x179c   :  { %1055 = vrot.lane.b32.xlu2 %v1053_v52, %s1539_s27 }
0x17a4   :  { %637 = vrot.lane.b32.xlu2 %v635_v53, %s1539_s27 }
0x17f6   :  { %v1056_v54 = vpop.permute.xlu2 %1055 }
0x17f7   :  { %v1058_v39 = vadd.f32 %v1056_v54, %v724_v33 }
0x17f9   :  { %1508 = vtanh.f32 %v1058_v39 }
0x17fa   :  { %1510 = vpow2.f32 %v1372_v58 }
0x17fe   :  { %v638_v36 = vpop.permute.xlu2 %637 }
0x17ff   :  { %v1509_v55 = vpop.eup %1508 }
0x1800   :  { %1062 = vrot.lane.b32.xlu0 %v1509_v55, %s1541_s4  ;;  %v1511_v59 = vpop.eup %1510 }
0x1801   :  { %v619_v6 = vadd.f32 1.0, %v1511_v59 }
0x1803   :  { %1512 = vrcp.f32 %v619_v6  ;;  %v631_v13 = vand.u32 2147483648, %v619_v6  ;;  %vm625_vm7 = vweird.f32 %v619_v6  ;;  %v629_v8 = vand.u32 2147483647, %v619_v6 }
0x1805   :  { %v632_v12 = vor.u32 1.1754944e-38, %v631_v13  ;;  %vm630_vm9 = vcmp.eq.f32.partialorder %v629_v8, 8.507059e+37 }
0x1809   :  { %v1513_v60 = vpop.eup %1512 }
0x180a   :  { %v621_v61 = vmul.f32 %v1513_v60, %v619_v6  ;;  %vm626_vm6 = vweird.f32 %v1513_v60 }
0x180b   :  { %vm627_vm8 = vmor %vm625_vm7, %vm626_vm6  ;;  %vm1308_vm7 = vcmask 80896  }
0x180c   :  { %v622_v62 = vsub.f32 1.0, %v621_v61 }
0x180e   :  { %v623_v44 = vmul.f32 %v1513_v60, %v622_v62 }
0x1810   :  { %v624_v7 = vadd.f32 %v1513_v60, %v623_v44 }
0x1812   :  { %v628_v11 = vsel %vm627_vm8, %v1513_v60, %v624_v7 }
0x1813   :  { %v633_v14 = vsel %vm630_vm9, %v632_v12, %v628_v11 }
0x1814   :  { %v640_v15 = vmul.f32 %v638_v36, %v633_v14  ;;  %v647_v49 = vsub.f32 1.0, %v633_v14  ;;  %v653_v51 = vmul.f32 %v633_v14, %v1788_v23 }
0x1872   :  { %v1063_v0 = vpop.permute.xlu0 %1062 }
0x1873   :  { %v1065_v2 = vmul.f32 %v1063_v0, %v1060_v63 }
0x1875   :  { %v1872_v4 = vadd.f32 %v1066_v1, %v1065_v2 }
0x1877   :  { %v1073_v37 = vpack.c.bf16 %v1872_v4, %v1872_v4 }
0x1879   :  { %1075 = vrot.lane.b32.xlu1 %v1073_v37, %s1541_s4 }
0x1881   :  { %642 = vrot.lane.b32.xlu1 %v640_v15, %s1539_s27 }
0x18eb   :  { %v1076_v16 = vpop.permute.xlu1 %1075 }
0x18ec   :  { %1402 = vmatmul.msk.bf16.vlgmr.msra.gmra.mxu0 %vm140_vm5, %v1076_v16 }
0x18f3   :  { %v643_v3 = vpop.permute.xlu1 %642 }
0x18f4   :  { %v645_v17 = vadd.f32 %v643_v3, %v119_v10 }
0x18f6   :  { %1514 = vtanh.f32 %v645_v17 }
0x18fc   :  { %v1515_v22 = vpop.eup %1514 }
0x1969   :  { %v1089_v19 = vpop.f32.mrf.mxu0 }
0x196a   :  { %v1113_v20 = vadd.f32 %v1089_v19, %v1772_v31  ;;  %v1093_v28 = vadd.f32 %v1089_v19, %v726_v27 }
0x196c   :  { %1115 = vrot.lane.b32.xlu0 %v1113_v20, %s1539_s27  ;;  %v1403_v29 = vmul.f32 -1.442695, %v1093_v28 }
0x196e   :  { %1516 = vpow2.f32 %v1403_v29 }
0x1971   :  { %v1091_v21 = vpop.f32.mrf.mxu0 }
0x1974   :  { %649 = vrot.lane.b32.xlu0 %v1515_v22, %s1541_s4  ;;  %v1517_v30 = vpop.eup %1516 }
0x1975   :  { %v1097_v33 = vadd.f32 1.0, %v1517_v30 }
0x1977   :  { %1518 = vrcp.f32 %v1097_v33  ;;  %v1109_v42 = vand.u32 2147483648, %v1097_v33  ;;  %vm1103_vm11 = vweird.f32 %v1097_v33  ;;  %v1107_v43 = vand.u32 2147483647, %v1097_v33 }
0x1979   :  { %v1110_v46 = vor.u32 1.1754944e-38, %v1109_v42  ;;  %vm1108_vm12 = vcmp.eq.f32.partialorder %v1107_v43, 8.507059e+37 }
0x197d   :  { %v1519_v34 = vpop.eup %1518 }
0x197e   :  { %v1099_v35 = vmul.f32 %v1519_v34, %v1097_v33  ;;  %vm1104_vm10 = vweird.f32 %v1519_v34 }
0x197f   :  { %vm1105_vm0 = vmor %vm1103_vm11, %vm1104_vm10 }
0x1980   :  { %v1100_v38 = vsub.f32 1.0, %v1099_v35 }
0x1982   :  { %v1101_v40 = vmul.f32 %v1519_v34, %v1100_v38 }
0x1984   :  { %v1102_v41 = vadd.f32 %v1519_v34, %v1101_v40 }
0x1986   :  { %v1106_v45 = vsel %vm1105_vm0, %v1519_v34, %v1102_v41 }
0x1987   :  { %v1111_v24 = vsel %vm1108_vm12, %v1110_v46, %v1106_v45 }
0x1988   :  { %v1131_v60 = vmul.f32 %v1111_v24, %v1872_v4 }
0x19de   :  { %v1116_v47 = vpop.permute.xlu0 %1115 }
0x19df   :  { %v1118_v25 = vmul.f32 %v1116_v47, %v1111_v24 }
0x19e1   :  { %1120 = vrot.lane.b32.xlu2 %v1118_v25, %s1539_s27 }
0x19e6   :  { %v650_v50 = vpop.permute.xlu0 %649 }
0x19e7   :  { %v652_v52 = vmul.f32 %v650_v50, %v647_v49 }
0x19e9   :  { %v654_v53 = vadd.f32 %v653_v51, %v652_v52  ;;  %591 = vrot.lane.b32.xlu2 %v1788_v23, %s1541_s4  ;;  %v1125_v23 = vsub.f32 1.0, %v1111_v24 }
0x19eb   :  { %656 = vrot.lane.b32.xlu0 %v654_v53, %s1541_s4 }
0x1a3b   :  { %v1121_v54 = vpop.permute.xlu2 %1120 }
0x1a3c   :  { %v1123_v39 = vadd.f32 %v1121_v54, %v726_v27 }
0x1a3e   :  { %1520 = vtanh.f32 %v1123_v39 }
0x1a43   :  { %v592_v55 = vpop.permute.xlu2 %591 }
0x1a44   :  { %v1521_v56 = vpop.eup %1520  ;;  %594 = vst.msk [vmem:[#allocation2 + $0x30] sm:$0xff] %vm140_vm5, %v592_v55 }
0x1a45   :  { %1127 = vrot.lane.b32.xlu1 %v1521_v56, %s1541_s4 }
0x1a4b   :  { %v666_v57 = vld [vmem:[#allocation2 + $0x30] sm:$0xff] }
0x1a5d   :  { %v657_v10 = vpop.permute.xlu0 %656 }
0x1a5e   :  { %659 = vst.msk [vmem:[#allocation2 + $0x38] sm:$0xff] %vm140_vm5, %v657_v10 }
0x1a65   :  { %v667_v58 = vld [vmem:[#allocation2 + $0x38] sm:$0xff] }
0x1a66   :  { %v671_v59 = vpack.c.bf16 %v667_v58, %v666_v57 }
0x1a68   :  { %1384 = vmatmul.msk.bf16.gmra.mxu3 %vm140_vm5, %v671_v59 }
0x1ab7   :  { %v1128_v6 = vpop.permute.xlu1 %1127 }
0x1ab8   :  { %v1130_v61 = vmul.f32 %v1128_v6, %v1125_v23 }
0x1aba   :  { %v1893_v62 = vadd.f32 %v1131_v60, %v1130_v61 }
0x1abc   :  { %v1138_v63 = vpack.c.bf16 %v1893_v62, %v1893_v62 }
0x1abe   :  { %1140 = vrot.lane.b32.xlu1 %v1138_v63, %s1541_s4 }
0x1aeb   :  { %v728_v7 = vpop.f32.mrf.mxu3 }
0x1aec   :  { %v729_v37 = vadd.f32 %v1779_v5, %v728_v7  ;;  %v1429_v7 = vld [vmem:[%s1966_s9 + $0x8] sm:$0xff] }
0x1aed   :  { %1301 = vmatpush.bf16.msrb.mxu0 %v1429_v7 }
0x1af3   :  { %v730_v47 = vpop.f32.mrf.mxu3 }
0x1af4   :  { %v731_v24 = vadd.f32 %v1779_v5, %v730_v47 }
0x1b30   :  { %v1141_v0 = vpop.permute.xlu1 %1140 }
0x1b31   :  { %1404 = vmatmul.msk.bf16.vlgmr.msrb.gmra.mxu1 %vm140_vm5, %v1141_v0 }
0x1bae   :  { %v1154_v44 = vpop.f32.mrf.mxu1 }
0x1baf   :  { %v1178_v1 = vadd.f32 %v1154_v44, %v1772_v31  ;;  %v1158_v13 = vadd.f32 %v1154_v44, %v729_v37 }
0x1bb1   :  { %1180 = vrot.lane.b32.xlu2 %v1178_v1, %s1539_s27  ;;  %v1405_v8 = vmul.f32 -1.442695, %v1158_v13 }
0x1bb3   :  { %1522 = vpow2.f32 %v1405_v8 }
0x1bb6   :  { %v1156_v2 = vpop.f32.mrf.mxu1 }
0x1bb9   :  { %v1523_v11 = vpop.eup %1522 }
0x1bba   :  { %v1162_v12 = vadd.f32 1.0, %v1523_v11  ;;  %v1437_v11 = vld [vmem:[%s1967_s10] ss:$0 sm:$0xff] }
0x1bbc   :  { %1524 = vrcp.f32 %v1162_v12  ;;  %v1174_v17 = vand.u32 2147483648, %v1162_v12  ;;  %vm1168_vm14 = vweird.f32 %v1162_v12  ;;  %v1172_v19 = vand.u32 2147483647, %v1162_v12 }
0x1bbe   :  { %v1175_v21 = vor.u32 1.1754944e-38, %v1174_v17  ;;  %vm1173_vm1 = vcmp.eq.f32.partialorder %v1172_v19, 8.507059e+37 }
0x1bc2   :  { %v1525_v36 = vpop.eup %1524 }
0x1bc3   :  { %v1164_v14 = vmul.f32 %v1525_v36, %v1162_v12  ;;  %vm1169_vm13 = vweird.f32 %v1525_v36 }
0x1bc4   :  { %vm1170_vm15 = vmor %vm1168_vm14, %vm1169_vm13 }
0x1bc5   :  { %v1165_v15 = vsub.f32 1.0, %v1164_v14 }
0x1bc7   :  { %v1166_v16 = vmul.f32 %v1525_v36, %v1165_v15 }
0x1bc9   :  { %v1167_v3 = vadd.f32 %v1525_v36, %v1166_v16 }
0x1bcb   :  { %v1171_v20 = vsel %vm1170_vm15, %v1525_v36, %v1167_v3 }
0x1bcc   :  { %v1176_v22 = vsel %vm1173_vm1, %v1175_v21, %v1171_v20 }
0x1bcd   :  { %v1190_v33 = vsub.f32 1.0, %v1176_v22  ;;  %v1196_v35 = vmul.f32 %v1176_v22, %v1893_v62 }
0x1c0b   :  { %v1181_v26 = vpop.permute.xlu2 %1180 }
0x1c0c   :  { %v1183_v27 = vmul.f32 %v1181_v26, %v1176_v22 }
0x1c0e   :  { %1185 = vrot.lane.b32.xlu0 %v1183_v27, %s1539_s27 }
0x1c80   :  { %v1186_v28 = vpop.permute.xlu0 %1185 }
0x1c81   :  { %v1188_v29 = vadd.f32 %v1186_v28, %v729_v37  ;;  %v1428_v37 = vld [vmem:[%s1966_s9] sm:$0xff] }
0x1c82   :  { %1302 = vmatpush.bf16.msrb.mxu0 %v1428_v37 }
0x1c83   :  { %1526 = vtanh.f32 %v1188_v29 }
0x1c89   :  { %v1527_v30 = vpop.eup %1526 }
0x1c8a   :  { %1192 = vrot.lane.b32.xlu1 %v1527_v30, %s1541_s4 }
0x1cfc   :  { %v1193_v34 = vpop.permute.xlu1 %1192 }
0x1cfd   :  { %v1195_v38 = vmul.f32 %v1193_v34, %v1190_v33 }
0x1cff   :  { %v1905_v40 = vadd.f32 %v1196_v35, %v1195_v38 }
0x1d01   :  { %v1203_v41 = vpack.c.bf16 %v1905_v40, %v1905_v40 }
0x1d03   :  { %1205 = vrot.lane.b32.xlu2 %v1203_v41, %s1541_s4 }
0x1d5d   :  { %v1206_v42 = vpop.permute.xlu2 %1205 }
0x1d5e   :  { %1406 = vmatmul.msk.bf16.vlgmr.msrb.gmra.mxu2 %vm140_vm5, %v1206_v42 }
0x1de1   :  { %v1219_v43 = vpop.f32.mrf.mxu2 }
0x1de2   :  { %v1243_v45 = vadd.f32 %v1219_v43, %v1772_v31  ;;  %v1223_v25 = vadd.f32 %v1219_v43, %v731_v24 }
0x1de4   :  { %1245 = vrot.lane.b32.xlu0 %v1243_v45, %s1539_s27  ;;  %v1407_v49 = vmul.f32 -1.442695, %v1223_v25 }
0x1de6   :  { %1528 = vpow2.f32 %v1407_v49 }
0x1de9   :  { %v1221_v46 = vpop.f32.mrf.mxu2 }
0x1dec   :  { %v1529_v50 = vpop.eup %1528 }
0x1ded   :  { %v1227_v51 = vadd.f32 1.0, %v1529_v50 }
0x1def   :  { %1530 = vrcp.f32 %v1227_v51  ;;  %v1239_v56 = vand.u32 2147483648, %v1227_v51  ;;  %vm1233_vm3 = vweird.f32 %v1227_v51  ;;  %v1237_v31 = vand.u32 2147483647, %v1227_v51 }
0x1df1   :  { %v1240_v57 = vor.u32 1.1754944e-38, %v1239_v56  ;;  %vm1238_vm6 = vcmp.eq.f32.partialorder %v1237_v31, 8.507059e+37 }
0x1df5   :  { %v1531_v52 = vpop.eup %1530 }
0x1df6   :  { %v1229_v53 = vmul.f32 %v1531_v52, %v1227_v51  ;;  %vm1234_vm2 = vweird.f32 %v1531_v52 }
0x1df7   :  { %vm1235_vm4 = vmor %vm1233_vm3, %vm1234_vm2 }
0x1df8   :  { %v1230_v54 = vsub.f32 1.0, %v1229_v53 }
0x1dfa   :  { %v1231_v39 = vmul.f32 %v1531_v52, %v1230_v54 }
0x1dfc   :  { %v1232_v55 = vadd.f32 %v1531_v52, %v1231_v39 }
0x1dfe   :  { %v1236_v10 = vsel %vm1235_vm4, %v1531_v52, %v1232_v55 }
0x1dff   :  { %v1241_v58 = vsel %vm1238_vm6, %v1240_v57, %v1236_v10 }
0x1e00   :  { %v1255_v61 = vsub.f32 1.0, %v1241_v58  ;;  %v1261_v0 = vmul.f32 %v1241_v58, %v1905_v40 }
0x1e56   :  { %v1246_v5 = vpop.permute.xlu0 %1245 }
0x1e57   :  { %v1248_v59 = vmul.f32 %v1246_v5, %v1241_v58 }
0x1e59   :  { %1250 = vrot.lane.b32.xlu1 %v1248_v59, %s1539_s27 }
0x1ecb   :  { %v1251_v23 = vpop.permute.xlu1 %1250 }
0x1ecc   :  { %v1253_v6 = vadd.f32 %v1251_v23, %v731_v24 }
0x1ece   :  { %1532 = vtanh.f32 %v1253_v6 }
0x1ed4   :  { %v1533_v60 = vpop.eup %1532 }
0x1ed5   :  { %1257 = vrot.lane.b32.xlu2 %v1533_v60, %s1541_s4 }
0x1f2f   :  { %v1258_v63 = vpop.permute.xlu2 %1257 }
0x1f30   :  { %v1260_v44 = vmul.f32 %v1258_v63, %v1255_v61 }
0x1f32   :  { %v1262_v1 = vadd.f32 %v1261_v0, %v1260_v44 }
0x1f34   :  { %v1268_v2 = vpack.c.bf16 %v1262_v1, %v1262_v1 }
0x1f36   :  { %1278 = vrot.lane.b32.xlu0 %v1268_v2, %s1541_s4 }
0x1f3e   :  { %809 = vrot.lane.b32.xlu0 %v1793_v32, %s1541_s4 }
0x1f46   :  { %874 = vrot.lane.b32.xlu0 %v1819_v9, %s1541_s4 }
0x1f4e   :  { %939 = vrot.lane.b32.xlu0 %v1833_v48, %s1541_s4 }
0x1f56   :  { %1004 = vrot.lane.b32.xlu0 %v1852_v18, %s1541_s4 }
0x1f5e   :  { %1069 = vrot.lane.b32.xlu0 %v1872_v4, %s1541_s4 }
0x1f66   :  { %1264 = vrot.lane.b32.xlu0 %v1262_v1, %s1541_s4 }
0x1fa8   :  { %v1279_v32 = vpop.permute.xlu0 %1278 }
0x1fa9   :  { %1416 = vmatmul.msk.bf16.vlgmr.msrb.gmra.mxu0 %vm140_vm5, %v1279_v32 }
0x1fb0   :  { %v810_v9 = vpop.permute.xlu0 %809 }
0x1fb1   :  { %812 = vst.msk [vmem:[#allocation2] sm:$0xff] %vm140_vm5, %v810_v9 }
0x1fb8   :  { %v875_v13 = vpop.permute.xlu0 %874 }
0x1fb9   :  { %877 = vst.msk [vmem:[#allocation2 + $0x8] sm:$0xff] %vm140_vm5, %v875_v13 }
0x1fc0   :  { %v940_v8 = vpop.permute.xlu0 %939 }
0x1fc1   :  { %942 = vst.msk [vmem:[#allocation2 + $0x10] sm:$0xff] %vm140_vm5, %v940_v8 }
0x1fc8   :  { %v1005_v48 = vpop.permute.xlu0 %1004 }
0x1fc9   :  { %1007 = vst.msk [vmem:[#allocation2 + $0x18] sm:$0xff] %vm140_vm5, %v1005_v48 }
0x1fd0   :  { %v1070_v18 = vpop.permute.xlu0 %1069 }
0x1fd1   :  { %1072 = vst.msk [vmem:[#allocation2 + $0x20] sm:$0xff] %vm140_vm5, %v1070_v18 }
0x1fd8   :  { %v1265_v4 = vpop.permute.xlu0 %1264 }
0x1fd9   :  { %1267 = vst.msk [vmem:[#allocation2 + $0x38] sm:$0xff] %vm140_vm5, %v1265_v4 }
0x2026   :  { %v1304_v12 = vpop.f32.mrf.mxu0 }
0x2027   :  { %v1305_v36 = vadd.f32 %v1437_v11, %v1304_v12 }
0x2029   :  { %v1309_v14 = vsel %vm1308_vm7, %v1305_v36, -inf }
0x202a   :  { %1310 = vmax.xlane.f32.xlu1 %v1309_v14 }
0x202e   :  { %v1306_v15 = vpop.f32.mrf.mxu0 }
0x2043   :  { %1199 = vrot.lane.b32.xlu1 %v1905_v40, %s1541_s4 }
0x209d   :  { %v1311_v16 = vpop.xlane.xlu1 %1310 }
0x209e   :  { %v1312_v3 = vsub.f32 %v1305_v36, %v1311_v16 }
0x20a0   :  { %v1313_v17 = vmul.f32 1.442695, %v1312_v3 }
0x20a2   :  { %1534 = vpow2.f32 %v1313_v17 }
0x20a8   :  { %v1535_v19 = vpop.eup %1534 }
0x20a9   :  { %v1315_v20 = vsel %vm1308_vm7, %v1535_v19, 0.0 }
0x20aa   :  { %1316 = vadd.xlane.f32.xlu2 %v1315_v20 }
0x20b5   :  { %v1200_v21 = vpop.permute.xlu1 %1199 }
0x20b6   :  { %1202 = vst.msk [vmem:[#allocation2 + $0x30] sm:$0xff] %vm140_vm5, %v1200_v21 }
0x20c2   :  { %1134 = vrot.lane.b32.xlu2 %v1893_v62, %s1541_s4 }
0x211d   :  { %v1317_v22 = vpop.xlane.xlu2 %1316 }
0x211e   :  { %1536 = vlog2.f32 %v1317_v22 }
0x2124   :  { %v1537_v26 = vpop.eup %1536 }
0x2125   :  { %v1319_v27 = vmul.f32 0.6931472, %v1537_v26  ;;  %v1135_v28 = vpop.permute.xlu2 %1134 }
0x2126   :  { %1137 = vst.msk [vmem:[#allocation2 + $0x28] sm:$0xff] %vm140_vm5, %v1135_v28 }
0x2127   :  { %v1320_v29 = vsub.f32 %v1312_v3, %v1319_v27 }
0x2129   :  { %1321 = vst.msk [vmem:[%s1968_s11] sm:$0xff] %vm1308_vm7, %v1320_v29 }

</bundles_post_ra>
